<compile_context>
chip_gen: v7x
topology: tpu7x:2x2x1
jax: 0.10.0
libtpu: 0.0.40
codegen_flags: <defaults>
</compile_context>

<pallas_src>
import numpy as np

import jax
import jax.numpy as jnp
from jax.experimental import pallas as pl
from jax.experimental.pallas import tpu as pltpu


# --------------------------- weight packing (host, once) ---------------------------

def _pack_conv1(w1, b1):
    """Banded conv1 weight. OUT1[oh, L] = sum_dh (x[dh:dh+24, :] @ band[dh])[oh, L],
    with lane L(ow, oc) = (ow % 2)*120 + (ow // 2)*10 + oc  (ow-parity in lane halves)."""
    band = np.zeros((5, 28, 240), np.float32)
    bias = np.zeros((1, 240), np.float32)
    for ow in range(24):
        lane0 = (ow % 2) * 120 + (ow // 2) * 10
        bias[0, lane0:lane0 + 10] = b1
        for dh in range(5):
            for dw in range(5):
                band[dh, ow + dw, lane0:lane0 + 10] = w1[:, 0, dh, dw]
    return band, bias


def _pack_conv2(w2, b2):
    """Banded conv2 weight. Input lane = pw*10 + ic; output lane
    L(ow, oc) = (ow % 2)*80 + (ow // 2)*20 + oc."""
    band = np.zeros((5, 120, 160), np.float32)
    bias = np.zeros((1, 160), np.float32)
    for ow in range(8):
        lane0 = (ow % 2) * 80 + (ow // 2) * 20
        bias[0, lane0:lane0 + 20] = b2
        for dh in range(5):
            for dw in range(5):
                pw = ow + dw
                for ic in range(10):
                    band[dh, pw * 10 + ic, lane0:lane0 + 20] = w2[:, ic, dh, dw]
    return band, bias


# --------------------------------- fused kernel ------------------------------------

def _net_kernel(x_ref, w1b_ref, b1v_ref, w2b_ref, b2v_ref,
                wf1_ref, bf1_ref, wf2_ref, bf2_ref,
                o_ref, h1_ref, h2_ref):
    f32 = jnp.float32
    x2d = x_ref[0, 0]                                   # (28, 28)

    # ---- conv1: 5 banded MXU matmuls (shift over kernel row dh) + bias ----
    acc1 = jnp.dot(x2d[0:24, :], w1b_ref[0], preferred_element_type=f32)
    for dh in range(1, 5):
        acc1 = acc1 + jnp.dot(x2d[dh:dh + 24, :], w1b_ref[dh],
                              preferred_element_type=f32)
    acc1 = acc1 + b1v_ref[...]                          # (24, 240)

    # ---- 2x2 max-pool + relu -> h1 (12, 120), lane = pw*10 + ic ----
    for i in range(12):
        row = jnp.maximum(acc1[2 * i:2 * i + 1, :], acc1[2 * i + 1:2 * i + 2, :])
        h1_ref[i:i + 1, :] = jnp.maximum(
            jnp.maximum(row[:, 0:120], row[:, 120:240]), 0.0)

    # ---- conv2 (Dropout2d is identity at inference): 5 banded matmuls + bias ----
    acc2 = jnp.dot(h1_ref[0:8, :], w2b_ref[0], preferred_element_type=f32)
    for dh in range(1, 5):
        acc2 = acc2 + jnp.dot(h1_ref[dh:dh + 8, :], w2b_ref[dh],
                              preferred_element_type=f32)
    acc2 = acc2 + b2v_ref[...]                          # (8, 160)

    # ---- 2x2 max-pool + relu -> h2 (4, 80), lane = pw*20 + oc ----
    for i in range(4):
        row = jnp.maximum(acc2[2 * i:2 * i + 1, :], acc2[2 * i + 1:2 * i + 2, :])
        h2_ref[i:i + 1, :] = jnp.maximum(
            jnp.maximum(row[:, 0:80], row[:, 80:160]), 0.0)

    # ---- fc1 + relu (PyTorch's NCHW view(-1, 320) order folded into wf1 packing) ----
    f1 = bf1_ref[...]                                   # (1, 50)
    for r in range(4):
        f1 = f1 + jnp.dot(h2_ref[r:r + 1, :], wf1_ref[r], preferred_element_type=f32)
    f1 = jnp.maximum(f1, 0.0)
    # F.dropout(training=False) is identity at inference.

    # ---- fc2 + log_softmax ----
    logits = jnp.dot(f1, wf2_ref[...], preferred_element_type=f32) + bf2_ref[...]
    m = jnp.max(logits, axis=-1, keepdims=True)
    lse = m + jnp.log(jnp.sum(jnp.exp(logits - m), axis=-1, keepdims=True))
    o_ref[0] = (logits - lse).astype(o_ref.dtype)


# ----------------------------------- wrapper ---------------------------------------

def build_forward(params):
    w1, b1, w2, b2, fw1, fb1, fw2, fb2 = [np.asarray(p, np.float32) for p in params]
    band1, bias1 = _pack_conv1(w1, b1)
    band2, bias2 = _pack_conv2(w2, b2)
    # fc1 weight permuted so that rows match our (ph, pw*20+oc) activation layout
    # while reproducing PyTorch's flatten order c*16 + h*4 + w.
    wf1p = np.ascontiguousarray(
        fw1.reshape(50, 20, 4, 4).transpose(2, 3, 1, 0).reshape(4, 80, 50))
    bf1p = fb1.reshape(1, 50)
    wf2p = np.ascontiguousarray(fw2.T)                  # (50, 10)
    bf2p = fb2.reshape(1, 10)
    packed = tuple(jnp.asarray(a) for a in
                   (band1, bias1, band2, bias2, wf1p, bf1p, wf2p, bf2p))

    def forward(x_nchw):
        N = x_nchw.shape[0]
        full = lambda shape: pl.BlockSpec(shape, lambda n, _s=shape: (0,) * len(_s))
        out = pl.pallas_call(
            _net_kernel,
            grid=(N,),
            in_specs=[
                pl.BlockSpec((1, 1, 28, 28), lambda n: (n, 0, 0, 0)),
                full((5, 28, 240)), full((1, 240)),
                full((5, 120, 160)), full((1, 160)),
                full((4, 80, 50)), full((1, 50)),
                full((50, 10)), full((1, 10)),
            ],
            out_specs=pl.BlockSpec((1, 1, 10), lambda n: (n, 0, 0)),
            out_shape=jax.ShapeDtypeStruct((N, 1, 10), jnp.float32),
            scratch_shapes=[pltpu.VMEM((12, 120), jnp.float32),
                            pltpu.VMEM((4, 80), jnp.float32)],
            compiler_params=pltpu.CompilerParams(
                dimension_semantics=("parallel",)),
        )(x_nchw, *packed)
        return out.reshape(N, 10)

    return jax.jit(forward)


# ------------------------------ pure-JAX reference ---------------------------------

def reference_forward(x_nchw, params):
    w1, b1, w2, b2, fw1, fb1, fw2, fb2 = params

    def conv(x, w, b):
        y = jax.lax.conv_general_dilated(
            x, w, window_strides=(1, 1), padding="VALID",
            dimension_numbers=("NCHW", "OIHW", "NCHW"))
        return y + b.reshape(1, -1, 1, 1)

    def pool2(x):
        return jax.lax.reduce_window(x, -jnp.inf, jax.lax.max,
                                     (1, 1, 2, 2), (1, 1, 2, 2), "VALID")

    h = jnp.maximum(pool2(conv(x_nchw, w1, b1)), 0.0)
    h = jnp.maximum(pool2(conv(h, w2, b2)), 0.0)        # Dropout2d: identity (eval)
    h = h.reshape(h.shape[0], 320)
    h = jnp.maximum(h @ fw1.T + fb1, 0.0)               # fc1 + relu; dropout: identity
    logits = h @ fw2.T + fb2
    return jax.nn.log_softmax(logits, axis=-1)


# ------------------------------------- main -----------------------------------------

if __name__ == "__main__":
    key = jax.random.PRNGKey(0)
    ks = jax.random.split(key, 9)
    # Deterministic synthetic parameters in PyTorch shapes.
    w1 = jax.random.normal(ks[0], (10, 1, 5, 5), jnp.float32) * 0.1    # conv1.weight
    b1 = jax.random.normal(ks[1], (10,), jnp.float32) * 0.1            # conv1.bias
    w2 = jax.random.normal(ks[2], (20, 10, 5, 5), jnp.float32) * 0.05  # conv2.weight
    b2 = jax.random.normal(ks[3], (20,), jnp.float32) * 0.05           # conv2.bias
    fw1 = jax.random.normal(ks[4], (50, 320), jnp.float32) * 0.05      # fc1.weight
    fb1 = jax.random.normal(ks[5], (50,), jnp.float32) * 0.05          # fc1.bias
    fw2 = jax.random.normal(ks[6], (10, 50), jnp.float32) * 0.1        # fc2.weight
    fb2 = jax.random.normal(ks[7], (10,), jnp.float32) * 0.1           # fc2.bias
    params = (w1, b1, w2, b2, fw1, fb1, fw2, fb2)

    # Input must be (N, 1, 28, 28) so that 20*4*4 = 320 after the two conv/pool stages.
    x = jax.random.normal(ks[8], (2, 1, 28, 28), jnp.float32)

    fwd = build_forward(params)
    out = fwd(x)
    jax.block_until_ready(out)
    assert out.shape == (2, 10) and out.dtype == jnp.float32

    ref = reference_forward(x, params)
    err = float(jnp.max(jnp.abs(out - ref)))
    assert err < 5e-2, f"mismatch vs reference: max abs err = {err}"

    print("KERNEL_OK")
</pallas_src>

<mosaic_0001>
module attributes {stable_mosaic.version = 11 : i64} {
  func.func @_net_kernel(%arg0: i32, %arg1: memref<1x1x28x28xf32, #tpu.memory_space<vmem>>, %arg2: memref<5x28x240xf32, #tpu.memory_space<vmem>>, %arg3: memref<1x240xf32, #tpu.memory_space<vmem>>, %arg4: memref<5x120x160xf32, #tpu.memory_space<vmem>>, %arg5: memref<1x160xf32, #tpu.memory_space<vmem>>, %arg6: memref<4x80x50xf32, #tpu.memory_space<vmem>>, %arg7: memref<1x50xf32, #tpu.memory_space<vmem>>, %arg8: memref<50x10xf32, #tpu.memory_space<vmem>>, %arg9: memref<1x10xf32, #tpu.memory_space<vmem>>, %arg10: memref<1x1x10xf32, #tpu.memory_space<vmem>>, %arg11: memref<12x120xf32, #tpu.memory_space<vmem>>, %arg12: memref<4x80xf32, #tpu.memory_space<vmem>>) attributes {dimension_semantics = [#tpu.dimension_semantics<parallel>], iteration_bounds = array<i64: 2>, scalar_prefetch = 0 : i64, scratch_operands = 2 : i64, tpu.core_type = #tpu.core_type<tc>, window_params = [{transform_indices = @transform_0, window_bounds = array<i64: 1, 1, 28, 28>}, {pipeline_mode = #tpu.pipeline_mode<synchronous>, transform_indices = @transform_1, window_bounds = array<i64: 5, 28, 240>}, {pipeline_mode = #tpu.pipeline_mode<synchronous>, transform_indices = @transform_2, window_bounds = array<i64: 1, 240>}, {pipeline_mode = #tpu.pipeline_mode<synchronous>, transform_indices = @transform_3, window_bounds = array<i64: 5, 120, 160>}, {pipeline_mode = #tpu.pipeline_mode<synchronous>, transform_indices = @transform_4, window_bounds = array<i64: 1, 160>}, {pipeline_mode = #tpu.pipeline_mode<synchronous>, transform_indices = @transform_5, window_bounds = array<i64: 4, 80, 50>}, {pipeline_mode = #tpu.pipeline_mode<synchronous>, transform_indices = @transform_6, window_bounds = array<i64: 1, 50>}, {pipeline_mode = #tpu.pipeline_mode<synchronous>, transform_indices = @transform_7, window_bounds = array<i64: 50, 10>}, {pipeline_mode = #tpu.pipeline_mode<synchronous>, transform_indices = @transform_8, window_bounds = array<i64: 1, 10>}, {transform_indices = @transform_9, window_bounds = array<i64: 1, 1, 10>}]} {
    %c0 = arith.constant 0 : index
    %c0_0 = arith.constant 0 : index
    %c0_1 = arith.constant 0 : index
    %c0_2 = arith.constant 0 : index
    %0 = vector.load %arg1[%c0, %c0_0, %c0_1, %c0_2] : memref<1x1x28x28xf32, #tpu.memory_space<vmem>>, vector<1x1x28x28xf32>
    %1 = vector.shape_cast %0 : vector<1x1x28x28xf32> to vector<28x28xf32>
    %2 = vector.extract_strided_slice %1 {offsets = [0, 0], sizes = [24, 28], strides = [1, 1]} : vector<28x28xf32> to vector<24x28xf32>
    %c0_3 = arith.constant 0 : index
    %c0_4 = arith.constant 0 : index
    %c0_5 = arith.constant 0 : index
    %3 = vector.load %arg2[%c0_3, %c0_4, %c0_5] : memref<5x28x240xf32, #tpu.memory_space<vmem>>, vector<1x28x240xf32>
    %4 = vector.shape_cast %3 : vector<1x28x240xf32> to vector<28x240xf32>
    %cst = arith.constant dense<0.000000e+00> : vector<24x240xf32>
    %5 = tpu.matmul %2, %4, %cst {dimension_numbers = #tpu.dot_dimension_numbers<[1], [0], [0], [1], [0, 0, 1, 1], [], []>} : vector<24x28xf32>, vector<28x240xf32>, vector<24x240xf32> -> vector<24x240xf32>
    %6 = vector.extract_strided_slice %1 {offsets = [1, 0], sizes = [24, 28], strides = [1, 1]} : vector<28x28xf32> to vector<24x28xf32>
    %c1 = arith.constant 1 : index
    %c0_6 = arith.constant 0 : index
    %c0_7 = arith.constant 0 : index
    %7 = vector.load %arg2[%c1, %c0_6, %c0_7] : memref<5x28x240xf32, #tpu.memory_space<vmem>>, vector<1x28x240xf32>
    %8 = vector.shape_cast %7 : vector<1x28x240xf32> to vector<28x240xf32>
    %cst_8 = arith.constant dense<0.000000e+00> : vector<24x240xf32>
    %9 = tpu.matmul %6, %8, %cst_8 {dimension_numbers = #tpu.dot_dimension_numbers<[1], [0], [0], [1], [0, 0, 1, 1], [], []>} : vector<24x28xf32>, vector<28x240xf32>, vector<24x240xf32> -> vector<24x240xf32>
    %10 = arith.addf %5, %9 : vector<24x240xf32>
    %11 = vector.extract_strided_slice %1 {offsets = [2, 0], sizes = [24, 28], strides = [1, 1]} : vector<28x28xf32> to vector<24x28xf32>
    %c2 = arith.constant 2 : index
    %c0_9 = arith.constant 0 : index
    %c0_10 = arith.constant 0 : index
    %12 = vector.load %arg2[%c2, %c0_9, %c0_10] : memref<5x28x240xf32, #tpu.memory_space<vmem>>, vector<1x28x240xf32>
    %13 = vector.shape_cast %12 : vector<1x28x240xf32> to vector<28x240xf32>
    %cst_11 = arith.constant dense<0.000000e+00> : vector<24x240xf32>
    %14 = tpu.matmul %11, %13, %cst_11 {dimension_numbers = #tpu.dot_dimension_numbers<[1], [0], [0], [1], [0, 0, 1, 1], [], []>} : vector<24x28xf32>, vector<28x240xf32>, vector<24x240xf32> -> vector<24x240xf32>
    %15 = arith.addf %10, %14 : vector<24x240xf32>
    %16 = vector.extract_strided_slice %1 {offsets = [3, 0], sizes = [24, 28], strides = [1, 1]} : vector<28x28xf32> to vector<24x28xf32>
    %c3 = arith.constant 3 : index
    %c0_12 = arith.constant 0 : index
    %c0_13 = arith.constant 0 : index
    %17 = vector.load %arg2[%c3, %c0_12, %c0_13] : memref<5x28x240xf32, #tpu.memory_space<vmem>>, vector<1x28x240xf32>
    %18 = vector.shape_cast %17 : vector<1x28x240xf32> to vector<28x240xf32>
    %cst_14 = arith.constant dense<0.000000e+00> : vector<24x240xf32>
    %19 = tpu.matmul %16, %18, %cst_14 {dimension_numbers = #tpu.dot_dimension_numbers<[1], [0], [0], [1], [0, 0, 1, 1], [], []>} : vector<24x28xf32>, vector<28x240xf32>, vector<24x240xf32> -> vector<24x240xf32>
    %20 = arith.addf %15, %19 : vector<24x240xf32>
    %21 = vector.extract_strided_slice %1 {offsets = [4, 0], sizes = [24, 28], strides = [1, 1]} : vector<28x28xf32> to vector<24x28xf32>
    %c4 = arith.constant 4 : index
    %c0_15 = arith.constant 0 : index
    %c0_16 = arith.constant 0 : index
    %22 = vector.load %arg2[%c4, %c0_15, %c0_16] : memref<5x28x240xf32, #tpu.memory_space<vmem>>, vector<1x28x240xf32>
    %23 = vector.shape_cast %22 : vector<1x28x240xf32> to vector<28x240xf32>
    %cst_17 = arith.constant dense<0.000000e+00> : vector<24x240xf32>
    %24 = tpu.matmul %21, %23, %cst_17 {dimension_numbers = #tpu.dot_dimension_numbers<[1], [0], [0], [1], [0, 0, 1, 1], [], []>} : vector<24x28xf32>, vector<28x240xf32>, vector<24x240xf32> -> vector<24x240xf32>
    %25 = arith.addf %20, %24 : vector<24x240xf32>
    %c0_18 = arith.constant 0 : index
    %c0_19 = arith.constant 0 : index
    %26 = vector.load %arg3[%c0_18, %c0_19] : memref<1x240xf32, #tpu.memory_space<vmem>>, vector<1x240xf32>
    %27 = vector.broadcast %26 : vector<1x240xf32> to vector<24x240xf32>
    %28 = arith.addf %25, %27 : vector<24x240xf32>
    %29 = vector.extract_strided_slice %28 {offsets = [0, 0], sizes = [1, 240], strides = [1, 1]} : vector<24x240xf32> to vector<1x240xf32>
    %30 = vector.extract_strided_slice %28 {offsets = [1, 0], sizes = [1, 240], strides = [1, 1]} : vector<24x240xf32> to vector<1x240xf32>
    %31 = arith.maximumf %29, %30 : vector<1x240xf32>
    %32 = vector.extract_strided_slice %31 {offsets = [0, 0], sizes = [1, 120], strides = [1, 1]} : vector<1x240xf32> to vector<1x120xf32>
    %33 = vector.extract_strided_slice %31 {offsets = [0, 120], sizes = [1, 120], strides = [1, 1]} : vector<1x240xf32> to vector<1x120xf32>
    %34 = arith.maximumf %32, %33 : vector<1x120xf32>
    %cst_20 = arith.constant 0.000000e+00 : f32
    %35 = vector.broadcast %cst_20 : f32 to vector<1x120xf32>
    %36 = arith.maximumf %34, %35 : vector<1x120xf32>
    %c0_21 = arith.constant 0 : index
    %c0_22 = arith.constant 0 : index
    %37 = vector.load %arg11[%c0_21, %c0_22] : memref<12x120xf32, #tpu.memory_space<vmem>>, vector<1x120xf32>
    tpu.vector_store %arg11[%c0_21, %c0_22], %36 {strides = array<i32>} : memref<12x120xf32, #tpu.memory_space<vmem>>, vector<1x120xf32>,
    %38 = vector.extract_strided_slice %28 {offsets = [2, 0], sizes = [1, 240], strides = [1, 1]} : vector<24x240xf32> to vector<1x240xf32>
    %39 = vector.extract_strided_slice %28 {offsets = [3, 0], sizes = [1, 240], strides = [1, 1]} : vector<24x240xf32> to vector<1x240xf32>
    %40 = arith.maximumf %38, %39 : vector<1x240xf32>
    %41 = vector.extract_strided_slice %40 {offsets = [0, 0], sizes = [1, 120], strides = [1, 1]} : vector<1x240xf32> to vector<1x120xf32>
    %42 = vector.extract_strided_slice %40 {offsets = [0, 120], sizes = [1, 120], strides = [1, 1]} : vector<1x240xf32> to vector<1x120xf32>
    %43 = arith.maximumf %41, %42 : vector<1x120xf32>
    %cst_23 = arith.constant 0.000000e+00 : f32
    %44 = vector.broadcast %cst_23 : f32 to vector<1x120xf32>
    %45 = arith.maximumf %43, %44 : vector<1x120xf32>
    %c1_24 = arith.constant 1 : index
    %c0_25 = arith.constant 0 : index
    %46 = vector.load %arg11[%c1_24, %c0_25] : memref<12x120xf32, #tpu.memory_space<vmem>>, vector<1x120xf32>
    tpu.vector_store %arg11[%c1_24, %c0_25], %45 {strides = array<i32>} : memref<12x120xf32, #tpu.memory_space<vmem>>, vector<1x120xf32>,
    %47 = vector.extract_strided_slice %28 {offsets = [4, 0], sizes = [1, 240], strides = [1, 1]} : vector<24x240xf32> to vector<1x240xf32>
    %48 = vector.extract_strided_slice %28 {offsets = [5, 0], sizes = [1, 240], strides = [1, 1]} : vector<24x240xf32> to vector<1x240xf32>
    %49 = arith.maximumf %47, %48 : vector<1x240xf32>
    %50 = vector.extract_strided_slice %49 {offsets = [0, 0], sizes = [1, 120], strides = [1, 1]} : vector<1x240xf32> to vector<1x120xf32>
    %51 = vector.extract_strided_slice %49 {offsets = [0, 120], sizes = [1, 120], strides = [1, 1]} : vector<1x240xf32> to vector<1x120xf32>
    %52 = arith.maximumf %50, %51 : vector<1x120xf32>
    %cst_26 = arith.constant 0.000000e+00 : f32
    %53 = vector.broadcast %cst_26 : f32 to vector<1x120xf32>
    %54 = arith.maximumf %52, %53 : vector<1x120xf32>
    %c2_27 = arith.constant 2 : index
    %c0_28 = arith.constant 0 : index
    %55 = vector.load %arg11[%c2_27, %c0_28] : memref<12x120xf32, #tpu.memory_space<vmem>>, vector<1x120xf32>
    tpu.vector_store %arg11[%c2_27, %c0_28], %54 {strides = array<i32>} : memref<12x120xf32, #tpu.memory_space<vmem>>, vector<1x120xf32>,
    %56 = vector.extract_strided_slice %28 {offsets = [6, 0], sizes = [1, 240], strides = [1, 1]} : vector<24x240xf32> to vector<1x240xf32>
    %57 = vector.extract_strided_slice %28 {offsets = [7, 0], sizes = [1, 240], strides = [1, 1]} : vector<24x240xf32> to vector<1x240xf32>
    %58 = arith.maximumf %56, %57 : vector<1x240xf32>
    %59 = vector.extract_strided_slice %58 {offsets = [0, 0], sizes = [1, 120], strides = [1, 1]} : vector<1x240xf32> to vector<1x120xf32>
    %60 = vector.extract_strided_slice %58 {offsets = [0, 120], sizes = [1, 120], strides = [1, 1]} : vector<1x240xf32> to vector<1x120xf32>
    %61 = arith.maximumf %59, %60 : vector<1x120xf32>
    %cst_29 = arith.constant 0.000000e+00 : f32
    %62 = vector.broadcast %cst_29 : f32 to vector<1x120xf32>
    %63 = arith.maximumf %61, %62 : vector<1x120xf32>
    %c3_30 = arith.constant 3 : index
    %c0_31 = arith.constant 0 : index
    %64 = vector.load %arg11[%c3_30, %c0_31] : memref<12x120xf32, #tpu.memory_space<vmem>>, vector<1x120xf32>
    tpu.vector_store %arg11[%c3_30, %c0_31], %63 {strides = array<i32>} : memref<12x120xf32, #tpu.memory_space<vmem>>, vector<1x120xf32>,
    %65 = vector.extract_strided_slice %28 {offsets = [8, 0], sizes = [1, 240], strides = [1, 1]} : vector<24x240xf32> to vector<1x240xf32>
    %66 = vector.extract_strided_slice %28 {offsets = [9, 0], sizes = [1, 240], strides = [1, 1]} : vector<24x240xf32> to vector<1x240xf32>
    %67 = arith.maximumf %65, %66 : vector<1x240xf32>
    %68 = vector.extract_strided_slice %67 {offsets = [0, 0], sizes = [1, 120], strides = [1, 1]} : vector<1x240xf32> to vector<1x120xf32>
    %69 = vector.extract_strided_slice %67 {offsets = [0, 120], sizes = [1, 120], strides = [1, 1]} : vector<1x240xf32> to vector<1x120xf32>
    %70 = arith.maximumf %68, %69 : vector<1x120xf32>
    %cst_32 = arith.constant 0.000000e+00 : f32
    %71 = vector.broadcast %cst_32 : f32 to vector<1x120xf32>
    %72 = arith.maximumf %70, %71 : vector<1x120xf32>
    %c4_33 = arith.constant 4 : index
    %c0_34 = arith.constant 0 : index
    %73 = vector.load %arg11[%c4_33, %c0_34] : memref<12x120xf32, #tpu.memory_space<vmem>>, vector<1x120xf32>
    tpu.vector_store %arg11[%c4_33, %c0_34], %72 {strides = array<i32>} : memref<12x120xf32, #tpu.memory_space<vmem>>, vector<1x120xf32>,
    %74 = vector.extract_strided_slice %28 {offsets = [10, 0], sizes = [1, 240], strides = [1, 1]} : vector<24x240xf32> to vector<1x240xf32>
    %75 = vector.extract_strided_slice %28 {offsets = [11, 0], sizes = [1, 240], strides = [1, 1]} : vector<24x240xf32> to vector<1x240xf32>
    %76 = arith.maximumf %74, %75 : vector<1x240xf32>
    %77 = vector.extract_strided_slice %76 {offsets = [0, 0], sizes = [1, 120], strides = [1, 1]} : vector<1x240xf32> to vector<1x120xf32>
    %78 = vector.extract_strided_slice %76 {offsets = [0, 120], sizes = [1, 120], strides = [1, 1]} : vector<1x240xf32> to vector<1x120xf32>
    %79 = arith.maximumf %77, %78 : vector<1x120xf32>
    %cst_35 = arith.constant 0.000000e+00 : f32
    %80 = vector.broadcast %cst_35 : f32 to vector<1x120xf32>
    %81 = arith.maximumf %79, %80 : vector<1x120xf32>
    %c5 = arith.constant 5 : index
    %c0_36 = arith.constant 0 : index
    %82 = vector.load %arg11[%c5, %c0_36] : memref<12x120xf32, #tpu.memory_space<vmem>>, vector<1x120xf32>
    tpu.vector_store %arg11[%c5, %c0_36], %81 {strides = array<i32>} : memref<12x120xf32, #tpu.memory_space<vmem>>, vector<1x120xf32>,
    %83 = vector.extract_strided_slice %28 {offsets = [12, 0], sizes = [1, 240], strides = [1, 1]} : vector<24x240xf32> to vector<1x240xf32>
    %84 = vector.extract_strided_slice %28 {offsets = [13, 0], sizes = [1, 240], strides = [1, 1]} : vector<24x240xf32> to vector<1x240xf32>
    %85 = arith.maximumf %83, %84 : vector<1x240xf32>
    %86 = vector.extract_strided_slice %85 {offsets = [0, 0], sizes = [1, 120], strides = [1, 1]} : vector<1x240xf32> to vector<1x120xf32>
    %87 = vector.extract_strided_slice %85 {offsets = [0, 120], sizes = [1, 120], strides = [1, 1]} : vector<1x240xf32> to vector<1x120xf32>
    %88 = arith.maximumf %86, %87 : vector<1x120xf32>
    %cst_37 = arith.constant 0.000000e+00 : f32
    %89 = vector.broadcast %cst_37 : f32 to vector<1x120xf32>
    %90 = arith.maximumf %88, %89 : vector<1x120xf32>
    %c6 = arith.constant 6 : index
    %c0_38 = arith.constant 0 : index
    %91 = vector.load %arg11[%c6, %c0_38] : memref<12x120xf32, #tpu.memory_space<vmem>>, vector<1x120xf32>
    tpu.vector_store %arg11[%c6, %c0_38], %90 {strides = array<i32>} : memref<12x120xf32, #tpu.memory_space<vmem>>, vector<1x120xf32>,
    %92 = vector.extract_strided_slice %28 {offsets = [14, 0], sizes = [1, 240], strides = [1, 1]} : vector<24x240xf32> to vector<1x240xf32>
    %93 = vector.extract_strided_slice %28 {offsets = [15, 0], sizes = [1, 240], strides = [1, 1]} : vector<24x240xf32> to vector<1x240xf32>
    %94 = arith.maximumf %92, %93 : vector<1x240xf32>
    %95 = vector.extract_strided_slice %94 {offsets = [0, 0], sizes = [1, 120], strides = [1, 1]} : vector<1x240xf32> to vector<1x120xf32>
    %96 = vector.extract_strided_slice %94 {offsets = [0, 120], sizes = [1, 120], strides = [1, 1]} : vector<1x240xf32> to vector<1x120xf32>
    %97 = arith.maximumf %95, %96 : vector<1x120xf32>
    %cst_39 = arith.constant 0.000000e+00 : f32
    %98 = vector.broadcast %cst_39 : f32 to vector<1x120xf32>
    %99 = arith.maximumf %97, %98 : vector<1x120xf32>
    %c7 = arith.constant 7 : index
    %c0_40 = arith.constant 0 : index
    %100 = vector.load %arg11[%c7, %c0_40] : memref<12x120xf32, #tpu.memory_space<vmem>>, vector<1x120xf32>
    tpu.vector_store %arg11[%c7, %c0_40], %99 {strides = array<i32>} : memref<12x120xf32, #tpu.memory_space<vmem>>, vector<1x120xf32>,
    %101 = vector.extract_strided_slice %28 {offsets = [16, 0], sizes = [1, 240], strides = [1, 1]} : vector<24x240xf32> to vector<1x240xf32>
    %102 = vector.extract_strided_slice %28 {offsets = [17, 0], sizes = [1, 240], strides = [1, 1]} : vector<24x240xf32> to vector<1x240xf32>
    %103 = arith.maximumf %101, %102 : vector<1x240xf32>
    %104 = vector.extract_strided_slice %103 {offsets = [0, 0], sizes = [1, 120], strides = [1, 1]} : vector<1x240xf32> to vector<1x120xf32>
    %105 = vector.extract_strided_slice %103 {offsets = [0, 120], sizes = [1, 120], strides = [1, 1]} : vector<1x240xf32> to vector<1x120xf32>
    %106 = arith.maximumf %104, %105 : vector<1x120xf32>
    %cst_41 = arith.constant 0.000000e+00 : f32
    %107 = vector.broadcast %cst_41 : f32 to vector<1x120xf32>
    %108 = arith.maximumf %106, %107 : vector<1x120xf32>
    %c8 = arith.constant 8 : index
    %c0_42 = arith.constant 0 : index
    %109 = vector.load %arg11[%c8, %c0_42] : memref<12x120xf32, #tpu.memory_space<vmem>>, vector<1x120xf32>
    tpu.vector_store %arg11[%c8, %c0_42], %108 {strides = array<i32>} : memref<12x120xf32, #tpu.memory_space<vmem>>, vector<1x120xf32>,
    %110 = vector.extract_strided_slice %28 {offsets = [18, 0], sizes = [1, 240], strides = [1, 1]} : vector<24x240xf32> to vector<1x240xf32>
    %111 = vector.extract_strided_slice %28 {offsets = [19, 0], sizes = [1, 240], strides = [1, 1]} : vector<24x240xf32> to vector<1x240xf32>
    %112 = arith.maximumf %110, %111 : vector<1x240xf32>
    %113 = vector.extract_strided_slice %112 {offsets = [0, 0], sizes = [1, 120], strides = [1, 1]} : vector<1x240xf32> to vector<1x120xf32>
    %114 = vector.extract_strided_slice %112 {offsets = [0, 120], sizes = [1, 120], strides = [1, 1]} : vector<1x240xf32> to vector<1x120xf32>
    %115 = arith.maximumf %113, %114 : vector<1x120xf32>
    %cst_43 = arith.constant 0.000000e+00 : f32
    %116 = vector.broadcast %cst_43 : f32 to vector<1x120xf32>
    %117 = arith.maximumf %115, %116 : vector<1x120xf32>
    %c9 = arith.constant 9 : index
    %c0_44 = arith.constant 0 : index
    %118 = vector.load %arg11[%c9, %c0_44] : memref<12x120xf32, #tpu.memory_space<vmem>>, vector<1x120xf32>
    tpu.vector_store %arg11[%c9, %c0_44], %117 {strides = array<i32>} : memref<12x120xf32, #tpu.memory_space<vmem>>, vector<1x120xf32>,
    %119 = vector.extract_strided_slice %28 {offsets = [20, 0], sizes = [1, 240], strides = [1, 1]} : vector<24x240xf32> to vector<1x240xf32>
    %120 = vector.extract_strided_slice %28 {offsets = [21, 0], sizes = [1, 240], strides = [1, 1]} : vector<24x240xf32> to vector<1x240xf32>
    %121 = arith.maximumf %119, %120 : vector<1x240xf32>
    %122 = vector.extract_strided_slice %121 {offsets = [0, 0], sizes = [1, 120], strides = [1, 1]} : vector<1x240xf32> to vector<1x120xf32>
    %123 = vector.extract_strided_slice %121 {offsets = [0, 120], sizes = [1, 120], strides = [1, 1]} : vector<1x240xf32> to vector<1x120xf32>
    %124 = arith.maximumf %122, %123 : vector<1x120xf32>
    %cst_45 = arith.constant 0.000000e+00 : f32
    %125 = vector.broadcast %cst_45 : f32 to vector<1x120xf32>
    %126 = arith.maximumf %124, %125 : vector<1x120xf32>
    %c10 = arith.constant 10 : index
    %c0_46 = arith.constant 0 : index
    %127 = vector.load %arg11[%c10, %c0_46] : memref<12x120xf32, #tpu.memory_space<vmem>>, vector<1x120xf32>
    tpu.vector_store %arg11[%c10, %c0_46], %126 {strides = array<i32>} : memref<12x120xf32, #tpu.memory_space<vmem>>, vector<1x120xf32>,
    %128 = vector.extract_strided_slice %28 {offsets = [22, 0], sizes = [1, 240], strides = [1, 1]} : vector<24x240xf32> to vector<1x240xf32>
    %129 = vector.extract_strided_slice %28 {offsets = [23, 0], sizes = [1, 240], strides = [1, 1]} : vector<24x240xf32> to vector<1x240xf32>
    %130 = arith.maximumf %128, %129 : vector<1x240xf32>
    %131 = vector.extract_strided_slice %130 {offsets = [0, 0], sizes = [1, 120], strides = [1, 1]} : vector<1x240xf32> to vector<1x120xf32>
    %132 = vector.extract_strided_slice %130 {offsets = [0, 120], sizes = [1, 120], strides = [1, 1]} : vector<1x240xf32> to vector<1x120xf32>
    %133 = arith.maximumf %131, %132 : vector<1x120xf32>
    %cst_47 = arith.constant 0.000000e+00 : f32
    %134 = vector.broadcast %cst_47 : f32 to vector<1x120xf32>
    %135 = arith.maximumf %133, %134 : vector<1x120xf32>
    %c11 = arith.constant 11 : index
    %c0_48 = arith.constant 0 : index
    %136 = vector.load %arg11[%c11, %c0_48] : memref<12x120xf32, #tpu.memory_space<vmem>>, vector<1x120xf32>
    tpu.vector_store %arg11[%c11, %c0_48], %135 {strides = array<i32>} : memref<12x120xf32, #tpu.memory_space<vmem>>, vector<1x120xf32>,
    %c0_49 = arith.constant 0 : index
    %c0_50 = arith.constant 0 : index
    %137 = vector.load %arg11[%c0_49, %c0_50] : memref<12x120xf32, #tpu.memory_space<vmem>>, vector<8x120xf32>
    %c0_51 = arith.constant 0 : index
    %c0_52 = arith.constant 0 : index
    %c0_53 = arith.constant 0 : index
    %138 = vector.load %arg4[%c0_51, %c0_52, %c0_53] : memref<5x120x160xf32, #tpu.memory_space<vmem>>, vector<1x120x160xf32>
    %139 = vector.shape_cast %138 : vector<1x120x160xf32> to vector<120x160xf32>
    %cst_54 = arith.constant dense<0.000000e+00> : vector<8x160xf32>
    %140 = tpu.matmul %137, %139, %cst_54 {dimension_numbers = #tpu.dot_dimension_numbers<[1], [0], [0], [1], [0, 0, 1, 1], [], []>} : vector<8x120xf32>, vector<120x160xf32>, vector<8x160xf32> -> vector<8x160xf32>
    %c1_55 = arith.constant 1 : index
    %c0_56 = arith.constant 0 : index
    %141 = vector.load %arg11[%c1_55, %c0_56] : memref<12x120xf32, #tpu.memory_space<vmem>>, vector<8x120xf32>
    %c1_57 = arith.constant 1 : index
    %c0_58 = arith.constant 0 : index
    %c0_59 = arith.constant 0 : index
    %142 = vector.load %arg4[%c1_57, %c0_58, %c0_59] : memref<5x120x160xf32, #tpu.memory_space<vmem>>, vector<1x120x160xf32>
    %143 = vector.shape_cast %142 : vector<1x120x160xf32> to vector<120x160xf32>
    %cst_60 = arith.constant dense<0.000000e+00> : vector<8x160xf32>
    %144 = tpu.matmul %141, %143, %cst_60 {dimension_numbers = #tpu.dot_dimension_numbers<[1], [0], [0], [1], [0, 0, 1, 1], [], []>} : vector<8x120xf32>, vector<120x160xf32>, vector<8x160xf32> -> vector<8x160xf32>
    %145 = arith.addf %140, %144 : vector<8x160xf32>
    %c2_61 = arith.constant 2 : index
    %c0_62 = arith.constant 0 : index
    %146 = vector.load %arg11[%c2_61, %c0_62] : memref<12x120xf32, #tpu.memory_space<vmem>>, vector<8x120xf32>
    %c2_63 = arith.constant 2 : index
    %c0_64 = arith.constant 0 : index
    %c0_65 = arith.constant 0 : index
    %147 = vector.load %arg4[%c2_63, %c0_64, %c0_65] : memref<5x120x160xf32, #tpu.memory_space<vmem>>, vector<1x120x160xf32>
    %148 = vector.shape_cast %147 : vector<1x120x160xf32> to vector<120x160xf32>
    %cst_66 = arith.constant dense<0.000000e+00> : vector<8x160xf32>
    %149 = tpu.matmul %146, %148, %cst_66 {dimension_numbers = #tpu.dot_dimension_numbers<[1], [0], [0], [1], [0, 0, 1, 1], [], []>} : vector<8x120xf32>, vector<120x160xf32>, vector<8x160xf32> -> vector<8x160xf32>
    %150 = arith.addf %145, %149 : vector<8x160xf32>
    %c3_67 = arith.constant 3 : index
    %c0_68 = arith.constant 0 : index
    %151 = vector.load %arg11[%c3_67, %c0_68] : memref<12x120xf32, #tpu.memory_space<vmem>>, vector<8x120xf32>
    %c3_69 = arith.constant 3 : index
    %c0_70 = arith.constant 0 : index
    %c0_71 = arith.constant 0 : index
    %152 = vector.load %arg4[%c3_69, %c0_70, %c0_71] : memref<5x120x160xf32, #tpu.memory_space<vmem>>, vector<1x120x160xf32>
    %153 = vector.shape_cast %152 : vector<1x120x160xf32> to vector<120x160xf32>
    %cst_72 = arith.constant dense<0.000000e+00> : vector<8x160xf32>
    %154 = tpu.matmul %151, %153, %cst_72 {dimension_numbers = #tpu.dot_dimension_numbers<[1], [0], [0], [1], [0, 0, 1, 1], [], []>} : vector<8x120xf32>, vector<120x160xf32>, vector<8x160xf32> -> vector<8x160xf32>
    %155 = arith.addf %150, %154 : vector<8x160xf32>
    %c4_73 = arith.constant 4 : index
    %c0_74 = arith.constant 0 : index
    %156 = vector.load %arg11[%c4_73, %c0_74] : memref<12x120xf32, #tpu.memory_space<vmem>>, vector<8x120xf32>
    %c4_75 = arith.constant 4 : index
    %c0_76 = arith.constant 0 : index
    %c0_77 = arith.constant 0 : index
    %157 = vector.load %arg4[%c4_75, %c0_76, %c0_77] : memref<5x120x160xf32, #tpu.memory_space<vmem>>, vector<1x120x160xf32>
    %158 = vector.shape_cast %157 : vector<1x120x160xf32> to vector<120x160xf32>
    %cst_78 = arith.constant dense<0.000000e+00> : vector<8x160xf32>
    %159 = tpu.matmul %156, %158, %cst_78 {dimension_numbers = #tpu.dot_dimension_numbers<[1], [0], [0], [1], [0, 0, 1, 1], [], []>} : vector<8x120xf32>, vector<120x160xf32>, vector<8x160xf32> -> vector<8x160xf32>
    %160 = arith.addf %155, %159 : vector<8x160xf32>
    %c0_79 = arith.constant 0 : index
    %c0_80 = arith.constant 0 : index
    %161 = vector.load %arg5[%c0_79, %c0_80] : memref<1x160xf32, #tpu.memory_space<vmem>>, vector<1x160xf32>
    %162 = vector.broadcast %161 : vector<1x160xf32> to vector<8x160xf32>
    %163 = arith.addf %160, %162 : vector<8x160xf32>
    %164 = vector.extract_strided_slice %163 {offsets = [0, 0], sizes = [1, 160], strides = [1, 1]} : vector<8x160xf32> to vector<1x160xf32>
    %165 = vector.extract_strided_slice %163 {offsets = [1, 0], sizes = [1, 160], strides = [1, 1]} : vector<8x160xf32> to vector<1x160xf32>
    %166 = arith.maximumf %164, %165 : vector<1x160xf32>
    %167 = vector.extract_strided_slice %166 {offsets = [0, 0], sizes = [1, 80], strides = [1, 1]} : vector<1x160xf32> to vector<1x80xf32>
    %168 = vector.extract_strided_slice %166 {offsets = [0, 80], sizes = [1, 80], strides = [1, 1]} : vector<1x160xf32> to vector<1x80xf32>
    %169 = arith.maximumf %167, %168 : vector<1x80xf32>
    %cst_81 = arith.constant 0.000000e+00 : f32
    %170 = vector.broadcast %cst_81 : f32 to vector<1x80xf32>
    %171 = arith.maximumf %169, %170 : vector<1x80xf32>
    %c0_82 = arith.constant 0 : index
    %c0_83 = arith.constant 0 : index
    %172 = vector.load %arg12[%c0_82, %c0_83] : memref<4x80xf32, #tpu.memory_space<vmem>>, vector<1x80xf32>
    tpu.vector_store %arg12[%c0_82, %c0_83], %171 {strides = array<i32>} : memref<4x80xf32, #tpu.memory_space<vmem>>, vector<1x80xf32>,
    %173 = vector.extract_strided_slice %163 {offsets = [2, 0], sizes = [1, 160], strides = [1, 1]} : vector<8x160xf32> to vector<1x160xf32>
    %174 = vector.extract_strided_slice %163 {offsets = [3, 0], sizes = [1, 160], strides = [1, 1]} : vector<8x160xf32> to vector<1x160xf32>
    %175 = arith.maximumf %173, %174 : vector<1x160xf32>
    %176 = vector.extract_strided_slice %175 {offsets = [0, 0], sizes = [1, 80], strides = [1, 1]} : vector<1x160xf32> to vector<1x80xf32>
    %177 = vector.extract_strided_slice %175 {offsets = [0, 80], sizes = [1, 80], strides = [1, 1]} : vector<1x160xf32> to vector<1x80xf32>
    %178 = arith.maximumf %176, %177 : vector<1x80xf32>
    %cst_84 = arith.constant 0.000000e+00 : f32
    %179 = vector.broadcast %cst_84 : f32 to vector<1x80xf32>
    %180 = arith.maximumf %178, %179 : vector<1x80xf32>
    %c1_85 = arith.constant 1 : index
    %c0_86 = arith.constant 0 : index
    %181 = vector.load %arg12[%c1_85, %c0_86] : memref<4x80xf32, #tpu.memory_space<vmem>>, vector<1x80xf32>
    tpu.vector_store %arg12[%c1_85, %c0_86], %180 {strides = array<i32>} : memref<4x80xf32, #tpu.memory_space<vmem>>, vector<1x80xf32>,
    %182 = vector.extract_strided_slice %163 {offsets = [4, 0], sizes = [1, 160], strides = [1, 1]} : vector<8x160xf32> to vector<1x160xf32>
    %183 = vector.extract_strided_slice %163 {offsets = [5, 0], sizes = [1, 160], strides = [1, 1]} : vector<8x160xf32> to vector<1x160xf32>
    %184 = arith.maximumf %182, %183 : vector<1x160xf32>
    %185 = vector.extract_strided_slice %184 {offsets = [0, 0], sizes = [1, 80], strides = [1, 1]} : vector<1x160xf32> to vector<1x80xf32>
    %186 = vector.extract_strided_slice %184 {offsets = [0, 80], sizes = [1, 80], strides = [1, 1]} : vector<1x160xf32> to vector<1x80xf32>
    %187 = arith.maximumf %185, %186 : vector<1x80xf32>
    %cst_87 = arith.constant 0.000000e+00 : f32
    %188 = vector.broadcast %cst_87 : f32 to vector<1x80xf32>
    %189 = arith.maximumf %187, %188 : vector<1x80xf32>
    %c2_88 = arith.constant 2 : index
    %c0_89 = arith.constant 0 : index
    %190 = vector.load %arg12[%c2_88, %c0_89] : memref<4x80xf32, #tpu.memory_space<vmem>>, vector<1x80xf32>
    tpu.vector_store %arg12[%c2_88, %c0_89], %189 {strides = array<i32>} : memref<4x80xf32, #tpu.memory_space<vmem>>, vector<1x80xf32>,
    %191 = vector.extract_strided_slice %163 {offsets = [6, 0], sizes = [1, 160], strides = [1, 1]} : vector<8x160xf32> to vector<1x160xf32>
    %192 = vector.extract_strided_slice %163 {offsets = [7, 0], sizes = [1, 160], strides = [1, 1]} : vector<8x160xf32> to vector<1x160xf32>
    %193 = arith.maximumf %191, %192 : vector<1x160xf32>
    %194 = vector.extract_strided_slice %193 {offsets = [0, 0], sizes = [1, 80], strides = [1, 1]} : vector<1x160xf32> to vector<1x80xf32>
    %195 = vector.extract_strided_slice %193 {offsets = [0, 80], sizes = [1, 80], strides = [1, 1]} : vector<1x160xf32> to vector<1x80xf32>
    %196 = arith.maximumf %194, %195 : vector<1x80xf32>
    %cst_90 = arith.constant 0.000000e+00 : f32
    %197 = vector.broadcast %cst_90 : f32 to vector<1x80xf32>
    %198 = arith.maximumf %196, %197 : vector<1x80xf32>
    %c3_91 = arith.constant 3 : index
    %c0_92 = arith.constant 0 : index
    %199 = vector.load %arg12[%c3_91, %c0_92] : memref<4x80xf32, #tpu.memory_space<vmem>>, vector<1x80xf32>
    tpu.vector_store %arg12[%c3_91, %c0_92], %198 {strides = array<i32>} : memref<4x80xf32, #tpu.memory_space<vmem>>, vector<1x80xf32>,
    %c0_93 = arith.constant 0 : index
    %c0_94 = arith.constant 0 : index
    %200 = vector.load %arg7[%c0_93, %c0_94] : memref<1x50xf32, #tpu.memory_space<vmem>>, vector<1x50xf32>
    %c0_95 = arith.constant 0 : index
    %c0_96 = arith.constant 0 : index
    %201 = vector.load %arg12[%c0_95, %c0_96] : memref<4x80xf32, #tpu.memory_space<vmem>>, vector<1x80xf32>
    %c0_97 = arith.constant 0 : index
    %c0_98 = arith.constant 0 : index
    %c0_99 = arith.constant 0 : index
    %202 = vector.load %arg6[%c0_97, %c0_98, %c0_99] : memref<4x80x50xf32, #tpu.memory_space<vmem>>, vector<1x80x50xf32>
    %203 = vector.shape_cast %202 : vector<1x80x50xf32> to vector<80x50xf32>
    %cst_100 = arith.constant dense<0.000000e+00> : vector<1x50xf32>
    %204 = tpu.matmul %201, %203, %cst_100 {dimension_numbers = #tpu.dot_dimension_numbers<[1], [0], [0], [1], [0, 0, 1, 1], [], []>} : vector<1x80xf32>, vector<80x50xf32>, vector<1x50xf32> -> vector<1x50xf32>
    %205 = arith.addf %200, %204 : vector<1x50xf32>
    %c1_101 = arith.constant 1 : index
    %c0_102 = arith.constant 0 : index
    %206 = vector.load %arg12[%c1_101, %c0_102] : memref<4x80xf32, #tpu.memory_space<vmem>>, vector<1x80xf32>
    %c1_103 = arith.constant 1 : index
    %c0_104 = arith.constant 0 : index
    %c0_105 = arith.constant 0 : index
    %207 = vector.load %arg6[%c1_103, %c0_104, %c0_105] : memref<4x80x50xf32, #tpu.memory_space<vmem>>, vector<1x80x50xf32>
    %208 = vector.shape_cast %207 : vector<1x80x50xf32> to vector<80x50xf32>
    %cst_106 = arith.constant dense<0.000000e+00> : vector<1x50xf32>
    %209 = tpu.matmul %206, %208, %cst_106 {dimension_numbers = #tpu.dot_dimension_numbers<[1], [0], [0], [1], [0, 0, 1, 1], [], []>} : vector<1x80xf32>, vector<80x50xf32>, vector<1x50xf32> -> vector<1x50xf32>
    %210 = arith.addf %205, %209 : vector<1x50xf32>
    %c2_107 = arith.constant 2 : index
    %c0_108 = arith.constant 0 : index
    %211 = vector.load %arg12[%c2_107, %c0_108] : memref<4x80xf32, #tpu.memory_space<vmem>>, vector<1x80xf32>
    %c2_109 = arith.constant 2 : index
    %c0_110 = arith.constant 0 : index
    %c0_111 = arith.constant 0 : index
    %212 = vector.load %arg6[%c2_109, %c0_110, %c0_111] : memref<4x80x50xf32, #tpu.memory_space<vmem>>, vector<1x80x50xf32>
    %213 = vector.shape_cast %212 : vector<1x80x50xf32> to vector<80x50xf32>
    %cst_112 = arith.constant dense<0.000000e+00> : vector<1x50xf32>
    %214 = tpu.matmul %211, %213, %cst_112 {dimension_numbers = #tpu.dot_dimension_numbers<[1], [0], [0], [1], [0, 0, 1, 1], [], []>} : vector<1x80xf32>, vector<80x50xf32>, vector<1x50xf32> -> vector<1x50xf32>
    %215 = arith.addf %210, %214 : vector<1x50xf32>
    %c3_113 = arith.constant 3 : index
    %c0_114 = arith.constant 0 : index
    %216 = vector.load %arg12[%c3_113, %c0_114] : memref<4x80xf32, #tpu.memory_space<vmem>>, vector<1x80xf32>
    %c3_115 = arith.constant 3 : index
    %c0_116 = arith.constant 0 : index
    %c0_117 = arith.constant 0 : index
    %217 = vector.load %arg6[%c3_115, %c0_116, %c0_117] : memref<4x80x50xf32, #tpu.memory_space<vmem>>, vector<1x80x50xf32>
    %218 = vector.shape_cast %217 : vector<1x80x50xf32> to vector<80x50xf32>
    %cst_118 = arith.constant dense<0.000000e+00> : vector<1x50xf32>
    %219 = tpu.matmul %216, %218, %cst_118 {dimension_numbers = #tpu.dot_dimension_numbers<[1], [0], [0], [1], [0, 0, 1, 1], [], []>} : vector<1x80xf32>, vector<80x50xf32>, vector<1x50xf32> -> vector<1x50xf32>
    %220 = arith.addf %215, %219 : vector<1x50xf32>
    %cst_119 = arith.constant 0.000000e+00 : f32
    %221 = vector.broadcast %cst_119 : f32 to vector<1x50xf32>
    %222 = arith.maximumf %220, %221 : vector<1x50xf32>
    %c0_120 = arith.constant 0 : index
    %c0_121 = arith.constant 0 : index
    %223 = vector.load %arg8[%c0_120, %c0_121] : memref<50x10xf32, #tpu.memory_space<vmem>>, vector<50x10xf32>
    %cst_122 = arith.constant dense<0.000000e+00> : vector<1x10xf32>
    %224 = tpu.matmul %222, %223, %cst_122 {dimension_numbers = #tpu.dot_dimension_numbers<[1], [0], [0], [1], [0, 0, 1, 1], [], []>} : vector<1x50xf32>, vector<50x10xf32>, vector<1x10xf32> -> vector<1x10xf32>
    %c0_123 = arith.constant 0 : index
    %c0_124 = arith.constant 0 : index
    %225 = vector.load %arg9[%c0_123, %c0_124] : memref<1x10xf32, #tpu.memory_space<vmem>>, vector<1x10xf32>
    %226 = arith.addf %224, %225 : vector<1x10xf32>
    %cst_125 = arith.constant dense<0xFF800000> : vector<1xf32>
    %227 = vector.multi_reduction <maximumf>, %226, %cst_125 [1] : vector<1x10xf32> to vector<1xf32>
    %228 = vector.shape_cast %227 : vector<1xf32> to vector<1x1xf32>
    %229 = vector.broadcast %228 : vector<1x1xf32> to vector<1x10xf32>
    %230 = arith.subf %226, %229 : vector<1x10xf32>
    %231 = math.exp %230 : vector<1x10xf32>
    %cst_126 = arith.constant dense<0.000000e+00> : vector<1xf32>
    %232 = vector.multi_reduction <add>, %231, %cst_126 [1] : vector<1x10xf32> to vector<1xf32>
    %233 = vector.shape_cast %232 : vector<1xf32> to vector<1x1xf32>
    %234 = math.log %233 : vector<1x1xf32>
    %235 = arith.addf %228, %234 : vector<1x1xf32>
    %236 = vector.broadcast %235 : vector<1x1xf32> to vector<1x10xf32>
    %237 = arith.subf %226, %236 : vector<1x10xf32>
    %c0_127 = arith.constant 0 : index
    %c0_128 = arith.constant 0 : index
    %c0_129 = arith.constant 0 : index
    %238 = vector.load %arg10[%c0_127, %c0_128, %c0_129] : memref<1x1x10xf32, #tpu.memory_space<vmem>>, vector<1x1x10xf32>
    %239 = vector.shape_cast %238 : vector<1x1x10xf32> to vector<1x10xf32>
    %240 = vector.shape_cast %237 : vector<1x10xf32> to vector<1x1x10xf32>
    tpu.vector_store %arg10[%c0_127, %c0_128, %c0_129], %240 {strides = array<i32>} : memref<1x1x10xf32, #tpu.memory_space<vmem>>, vector<1x1x10xf32>,
    return
  }
  func.func @transform_0(%arg0: i32) -> (i32, i32, i32, i32) {
    %c0_i32 = arith.constant 0 : i32
    %c0_i32_0 = arith.constant 0 : i32
    %c0_i32_1 = arith.constant 0 : i32
    %c0_i32_2 = arith.constant 0 : i32
    return %arg0, %c0_i32, %c0_i32_0, %c0_i32_1 : i32, i32, i32, i32
  }
  func.func @transform_1(%arg0: i32) -> (i32, i32, i32) {
    %c0_i32 = arith.constant 0 : i32
    %c0_i32_0 = arith.constant 0 : i32
    %c0_i32_1 = arith.constant 0 : i32
    %c0_i32_2 = arith.constant 0 : i32
    return %c0_i32, %c0_i32_0, %c0_i32_1 : i32, i32, i32
  }
  func.func @transform_2(%arg0: i32) -> (i32, i32) {
    %c0_i32 = arith.constant 0 : i32
    %c0_i32_0 = arith.constant 0 : i32
    %c0_i32_1 = arith.constant 0 : i32
    return %c0_i32, %c0_i32_0 : i32, i32
  }
  func.func @transform_3(%arg0: i32) -> (i32, i32, i32) {
    %c0_i32 = arith.constant 0 : i32
    %c0_i32_0 = arith.constant 0 : i32
    %c0_i32_1 = arith.constant 0 : i32
    %c0_i32_2 = arith.constant 0 : i32
    return %c0_i32, %c0_i32_0, %c0_i32_1 : i32, i32, i32
  }
  func.func @transform_4(%arg0: i32) -> (i32, i32) {
    %c0_i32 = arith.constant 0 : i32
    %c0_i32_0 = arith.constant 0 : i32
    %c0_i32_1 = arith.constant 0 : i32
    return %c0_i32, %c0_i32_0 : i32, i32
  }
  func.func @transform_5(%arg0: i32) -> (i32, i32, i32) {
    %c0_i32 = arith.constant 0 : i32
    %c0_i32_0 = arith.constant 0 : i32
    %c0_i32_1 = arith.constant 0 : i32
    %c0_i32_2 = arith.constant 0 : i32
    return %c0_i32, %c0_i32_0, %c0_i32_1 : i32, i32, i32
  }
  func.func @transform_6(%arg0: i32) -> (i32, i32) {
    %c0_i32 = arith.constant 0 : i32
    %c0_i32_0 = arith.constant 0 : i32
    %c0_i32_1 = arith.constant 0 : i32
    return %c0_i32, %c0_i32_0 : i32, i32
  }
  func.func @transform_7(%arg0: i32) -> (i32, i32) {
    %c0_i32 = arith.constant 0 : i32
    %c0_i32_0 = arith.constant 0 : i32
    %c0_i32_1 = arith.constant 0 : i32
    return %c0_i32, %c0_i32_0 : i32, i32
  }
  func.func @transform_8(%arg0: i32) -> (i32, i32) {
    %c0_i32 = arith.constant 0 : i32
    %c0_i32_0 = arith.constant 0 : i32
    %c0_i32_1 = arith.constant 0 : i32
    return %c0_i32, %c0_i32_0 : i32, i32
  }
  func.func @transform_9(%arg0: i32) -> (i32, i32, i32) {
    %c0_i32 = arith.constant 0 : i32
    %c0_i32_0 = arith.constant 0 : i32
    %c0_i32_1 = arith.constant 0 : i32
    return %arg0, %c0_i32, %c0_i32_0 : i32, i32, i32
  }
}

</mosaic_0001>

<bundles_post_ra>
// kernel: forward.1
= control target key start
LH: loop header
LB: loop body
LE: loop exit
PB: predicated region body
PF: predicated region fallthrough
CT: control target
= control target key end

     0   :  { %14 = vsyncpa [#allocation5], 0  ;;  %s3396_s0 = inlined_call_operand.vmem [shape: f32[2,1,28,28], index: 0, kind: input, shape index: {}]   ;;  %s3397_s1 = inlined_call_operand.hbm [shape: f32[5,28,240], index: 1, kind: input, shape index: {}]   ;;  %s3398_s2 = inlined_call_operand.vmem [shape: f32[1,240], index: 2, kind: input, shape index: {}]   ;;  %s3399_s3 = inlined_call_operand.hbm [shape: f32[5,120,160], index: 3, kind: input, shape index: {}]   ;;  %s3400_s4 = inlined_call_operand.vmem [shape: f32[1,160], index: 4, kind: input, shape index: {}]   ;;  %s3401_s5 = inlined_call_operand.hbm [shape: f32[4,80,50], index: 5, kind: input, shape index: {}]   ;;  %s3402_s6 = inlined_call_operand.vmem [shape: f32[1,50], index: 6, kind: input, shape index: {}]   ;;  %s3403_s7 = inlined_call_operand.vmem [shape: f32[50,10], index: 7, kind: input, shape index: {}]   ;;  %s3404_s8 = inlined_call_operand.vmem [shape: f32[1,10], index: 8, kind: input, shape index: {}]   ;;  %s3405_s9 = inlined_call_operand.hbm [shape: f32[2,1,10], index: 9, kind: output, shape index: {}]  }
   0x1   :  { %15 = vsyncpa [#allocation8], 0 }
   0x2   :  { %16 = vsyncpa [#allocation6], 0 }
   0x3   :  { %18 = vsyncpa [#allocation6 + $0x1], 0  ;;  %s2979_s30 = smov 0   ;;  %s2981_s10 = smov 0  }
   0x4   :  { %s2983_s11 = smov 0   ;;  %s2985_s12 = smov 0  }
   0x5 LB: > { %3414 = sst [smem:[#allocation14_spill]] %s2901_s30  ;;  %s3000_s13 = sadd.s32 4294967295, %s2913_s12   ;;  %s2913_s12 = sphi %s2985_s12, %s3435_s12   ;;  %s2909_s11 = sphi %s2983_s11, %s3437_s11   ;;  %s2905_s10 = sphi %s2981_s10, %s3439_s10   ;;  %s2901_s30 = sphi %s2979_s30, %s3438_s30  }
   0x6   : > { %3415 = sst [smem:[#allocation15_spill]] %s2909_s11  ;;  %s2164_s14 = sadd.s32 4294967294, %s2913_s12  }
   0x7   : > { %s3004_s15 = sadd.s32 1, %s2913_s12   ;;  %s225_s16 = sadd.s32 1, %s2909_s11 }
   0x8   : > { %3416 = sst [smem:[#allocation16_spill]] %s3004_s15  ;;  %s222_s17 = ssub.s32 %s2913_s12, %s3004_s15 }
   0x9   : > { %p235_p0 = scmp.ne.s32.totalorder %s2909_s11, %s2905_s10  ;;  %p223_p1 = scmp.eq.s32.totalorder %s222_s17, 0 }
   0xa   : > { %p236_p2 = scmp.eq.s32.totalorder %s3000_s13, 1  ;;  %p241_p3 = scmp.ne.s32.totalorder %s2905_s10, %s2901_s30 }
   0xb   : > { %p242_p4 = scmp.eq.s32.totalorder %s2164_s14, 1  ;;  %p2165_p7 = scmp.ge.s32.totalorder %s2913_s12, 1 }
   0xc   : > { %s3015_s18 = scalar_select %p223_p1, %s2909_s11, %s225_s16  }
   0xd   : > { %p3017_p5 = por %p236_p2, %p235_p0  ;;  %p3021_p6 = por %p242_p4, %p241_p3 }
   0xe   : > { %3417 = sst [smem:[#allocation17_spill]] %s3015_s18  ;;  %p249_p8 = scmp.lt.s32.totalorder %s2913_s12, 3 }
   0xf   : > { %s3418_s19 = scalar_select %p3017_p5, 1, 0 }
  0x10   : > { %s3419_s20 = scalar_select %p3021_p6, 1, 0 }
  0x11   : > { %p3406_p9 = scmp.eq.s32.totalorder %s3000_s13, 0  ;;  %p3028_p10 = pnand %p2165_p7, %p249_p8 }
  0x12   : > { %3420 = sst [smem:[#allocation18_spill]] %s3419_s20  ;;  %s2915_s22 = smov [#allocation7]  }
  0x13   : > { %s3421_s21 = scalar_select %p3028_p10, 1, 0 }
  0x14   : > { %p2689_p11 = pneg %p3028_p10  ;;  %s277_s23 = sshll.u32 %s2915_s22, 4  ;;  %s3034_s23 = int_to_ptr.vmem [resolvable:$true] %s277_s23 }
  0x15   : > { %s2916_s25 = smov [#allocation4]   ;;  %s2917_s27 = smov [#allocation9]  }
  0x16   : > { %p3038_p12 = pnand %p3406_p9, %p2689_p11  ;;  %s261_s26 = sshll.u32 %s2916_s25, 4  ;;  %s3042_s26 = int_to_ptr.vmem [resolvable:$true] %s261_s26 }
  0x17   : > { %s3044_s28 = sshll.u32 %s2917_s27, 4  ;;  %s2759_s16 = scalar_lea.hbm %s3399_s3, 19200  ;;  %s294_s28 = int_to_ptr.vmem [resolvable:$true] %s3044_s28 }
  0x18   : > { %p2760_p13 = scmp.ne.s32.totalorder %s3399_s3, %s2759_s16  ;;  %p3054_p0 = pneg %p3038_p12 }
  0x19   : > { %p2766_p3 = scmp.lt.u32.totalorder %s2759_s16, %s3399_s3 }
  0x1a   : > { %p2762_p1 = pnand %p3054_p0, %p2760_p13 }
  0x1c   : > { %p2763_p2 = pneg %p2762_p1 }
  0x1e   : > { %p2768_p4 = pnand %p2766_p3, %p2763_p2 }
  0x20   : > { %2771 = shalt.err (!%p2768_p4)
}
  0x21   : > { %s2772_s29 = scalar_lea.vmem %s3034_s23, 19200  ;;  %p2780_p9 = scmp.lt.s32.totalorder %s3034_s23, %s3034_s23 }
  0x22   : > { %p2773_p7 = scmp.ne.s32.totalorder %s3034_s23, %s2772_s29  ;;  %p2781_p6 = scmp.lt.s32.totalorder %s2772_s29, %s2772_s29 }
  0x24   : > { %p2775_p8 = pnand %p2773_p7, %p3054_p0  ;;  %p2782_p13 = por %p2781_p6, %p2780_p9 }
  0x26   : > { %p2776_p11 = pneg %p2775_p8 }
  0x28   : > { %p2783_p1 = pnand %p2782_p13, %p2776_p11 }
  0x2a   : > { %2786 = shalt.err (!%p2783_p1)
}
  0x2b   : > { %s2918_s14 = smov 256   ;;  %s2919_s16 = smov 16  }
  0x2c   : > { %2695 = dma.hbm_to_vmem [thread:$0]  (!%p3038_p12), %s3399_s3, 19200, %s3034_s23, [#allocation8], %s2918_s14, %s2918_s14, %s2919_s16  }
  0x2d   : > { %s2787_s11 = scalar_lea.hbm %s3397_s1, 5120 }
  0x2e   : > { %p2788_p6 = scmp.ne.s32.totalorder %s3397_s1, %s2787_s11  ;;  %p2794_p3 = scmp.lt.u32.totalorder %s2787_s11, %s3397_s1 }
  0x30   : > { %p2790_p9 = pnand %p2788_p6, %p3054_p0 }
  0x32   : > { %p2791_p2 = pneg %p2790_p9 }
  0x34   : > { %p2796_p4 = pnand %p2794_p3, %p2791_p2 }
  0x36   : > { %2799 = shalt.err (!%p2796_p4)
}
  0x37   : > { %s2800_s23 = scalar_lea.vmem %s3042_s26, 5120  ;;  %p2808_p13 = scmp.lt.s32.totalorder %s3042_s26, %s3042_s26 }
  0x38   : > { %p2801_p7 = scmp.ne.s32.totalorder %s3042_s26, %s2800_s23  ;;  %p2809_p1 = scmp.lt.s32.totalorder %s2800_s23, %s2800_s23 }
  0x3a   : > { %p2803_p8 = pnand %p2801_p7, %p3054_p0  ;;  %p2810_p6 = por %p2809_p1, %p2808_p13 }
  0x3c   : > { %p2804_p11 = pneg %p2803_p8 }
  0x3e   : > { %p2811_p9 = pnand %p2810_p6, %p2804_p11 }
  0x40   : > { %2814 = shalt.err (!%p2811_p9)
}
  0x41   : > { %2692 = dma.hbm_to_vmem [thread:$0]  (!%p3038_p12), %s3397_s1, 5120, %s3042_s26, [#allocation5], %s2918_s14, %s2918_s14, %s2919_s16  }
  0x42   : > { %s2815_s17 = scalar_lea.hbm %s3401_s5, 5120 }
  0x43   : > { %p2816_p2 = scmp.ne.s32.totalorder %s3401_s5, %s2815_s17  ;;  %p2822_p7 = scmp.lt.u32.totalorder %s2815_s17, %s3401_s5 }
  0x45   : > { %p2818_p3 = pnand %p2816_p2, %p3054_p0 }
  0x47   : > { %p2819_p4 = pneg %p2818_p3 }
  0x49   : > { %p2824_p8 = pnand %p2822_p7, %p2819_p4 }
  0x4b   : > { %2827 = shalt.err (!%p2824_p8)
}
  0x4c   : > { %s2828_s23 = scalar_lea.vmem %s294_s28, 5120  ;;  %p2836_p6 = scmp.lt.s32.totalorder %s294_s28, %s294_s28 }
  0x4d   : > { %p2829_p11 = scmp.ne.s32.totalorder %s294_s28, %s2828_s23  ;;  %p2837_p9 = scmp.lt.s32.totalorder %s2828_s23, %s2828_s23 }
  0x4f   : > { %p2831_p13 = pnand %p2829_p11, %p3054_p0  ;;  %p2838_p5 = por %p2837_p9, %p2836_p6 }
  0x51   : > { %p2832_p1 = pneg %p2831_p13 }
  0x53   : > { %p2839_p10 = pnand %p2838_p5, %p2832_p1 }
  0x55   : > { %2842 = shalt.err (!%p2839_p10)
}
  0x56   : > { %s2920_s26 = smov 128   ;;  %s2921_s14 = smov 8  }
  0x57   : > { %2698 = dma.hbm_to_vmem [thread:$0]  (!%p3038_p12), %s3401_s5, 5120, %s294_s28, [#allocation8], %s2920_s26, %s2920_s26, %s2921_s14  }
  0x58   : > { %p3424_p2 = scmp.ne.s32.totalorder %s3421_s21, 0 }
  0x59   : > { %p3425_p3 = scmp.eq.s32.totalorder (!%p3424_p2), %s3000_s13, 0 }
  0x5a   : > { %326 = sbr.rel (%p3424_p2) target bundleno = 1809 (0x711), region = 56 }
  0x61   : > { %2888 = dma.done.wait (%p3425_p3), [#allocation5], 5120   ;;  %p3426_p0 = pmov %p3425_p3 }
  0x63   : > { %2890 = vsyncadd (%p3426_p0), [#allocation5], 4294962176  ;;  %p3427_p5 = pmov %p3426_p0 }
  0x64   : > { %p3428_p10 = pmov %p3426_p0 }
  0x65   : > { %2892 = dma.done.wait (%p3427_p5), [#allocation8], 24320  }
  0x66   : > { %2894 = vsyncadd (%p3428_p10), [#allocation8], 4294942976  ;;  %p369_p4 = scmp.lt.s32.totalorder %s3000_s13, 1  ;;  %v2922_v0 = vmov 0.0   ;;  %vm414_vm0 = vcmask 1043456   ;;  %vm2923_vm1 = vmmov 1  }
  0x67   : > { %485 = vmatprep.mubr.f32.mxu0 %v2922_v0  ;;  %1172 = vmatprep.mubr.f32.mxu1 %v2922_v0  ;;  %vm3132_vm2 = vmpackc.low %vm414_vm0, %vm2923_vm1  ;;  %v388_v2 = vld [vmem:[#allocation4 + $0x48] sm:$0xff]  ;;  %v390_v3 = vld [vmem:[#allocation4 + $0x58] sm:$0xff]  ;;  %vm399_vm3 = vcmask 1046528   ;;  %vm407_vm4 = vcmask 228352   ;;  %vm608_vm5 = vcmask 1045504   ;;  %vm726_vm6 = vcmask 1044480  }
  0x68   : > { %s370_s18 = scalar_select %p369_p4, %s3000_s13, 1  ;;  %v387_v4 = vld [vmem:[#allocation4 + $0x40] sm:$0xff]  ;;  %v2377_v5 = vpack.c.bf16 %v390_v3, %v388_v2  ;;  %v389_v6 = vld [vmem:[#allocation4 + $0x50] sm:$0xff]  ;;  %v392_v7 = vld [vmem:[#allocation4 + $0x68] sm:$0xff]  ;;  %vm984_vm7 = vcmask 64512   ;;  %vm989_vm8 = vcmask 974848  }
  0x69   : > { %v394_v8 = vld [vmem:[#allocation4 + $0x78] sm:$0xf]  ;;  %v2379_v9 = vpack.c.bf16 %v389_v6, %v387_v4  ;;  %v391_v11 = vld [vmem:[#allocation4 + $0x60] sm:$0xff]  ;;  %v393_v12 = vld [vmem:[#allocation4 + $0x70] sm:$0xf]  ;;  %s2924_s17 = smov 8  }
  0x6a   : > { %s2215_s21 = sshll.u32 %s370_s18, 5  ;;  %v2381_v10 = vpack.c.bf16 %v394_v8, %v392_v7  ;;  %2378 = vmatprep.subr.bf16.mxu0 %v2377_v5  ;;  %v379_v15 = vld [vmem:[#allocation4 + $0x8] sm:$0xff]  ;;  %v381_v16 = vld [vmem:[#allocation4 + $0x18] sm:$0xff]  ;;  %v2384_v17 = vpack.c.bf16 %v393_v12, %v391_v11  ;;  %v378_v21 = vld [vmem:[#allocation4] sm:$0xff]  ;;  %vm991_vm9 = vcmask 976898   ;;  %vm993_vm10 = vcmask 978948  }
  0x6b   : > { %s3139_s11 = scalar_lea.vmem %s3396_s0, %s2215_s21  ;;  %2380 = vmatpush1.bf16.msra.mxu0 %v2379_v9  ;;  %v2387_v20 = vpack.c.bf16 %v381_v16, %v379_v15  ;;  %v380_v22 = vld [vmem:[#allocation4 + $0x10] sm:$0xff]  ;;  %v383_v24 = vld [vmem:[#allocation4 + $0x28] sm:$0xff]  ;;  %v385_v25 = vld [vmem:[#allocation4 + $0x38] sm:$0xf]  ;;  %vm995_vm11 = vcmask 980998   ;;  %vm1104_vm12 = vcmask 982016  }
  0x6c   : > { %v3142_v13 = vld [vmem:[%s3139_s11] sm:$0xff]  ;;  %v3145_v14 = vld [vmem:[%s3139_s11 + $0x8] sm:$0xff]  ;;  %2383 = vmatprep.subr.msk.bf16.mxu0 %vm3132_vm2, %v2381_v10  ;;  %v3152_v23 = vld [vmem:[%s3139_s11 + $0x10] sm:$0xff]  ;;  %v2389_v27 = vpack.c.bf16 %v380_v22, %v378_v21  ;;  %v2391_v29 = vpack.c.bf16 %v385_v25, %v383_v24  ;;  %vm2926_vm13 = vmmov 0   ;;  %s2927_s27 = smov 48   ;;  %vm1605_vm14 = vcmask 392192  }
  0x6d   : > { %v400_v18 = vrot.slane %v3142_v13, 1  ;;  %v401_v19 = vrot.slane %v3145_v14, 1  ;;  %v403_v28 = vrot.slane %v3152_v23, 1  ;;  %v382_v30 = vld [vmem:[#allocation4 + $0x20] sm:$0xff]  ;;  %v384_v31 = vld [vmem:[#allocation4 + $0x30] sm:$0xf] }
  0x6e   : > { %v3159_v32 = vld [vmem:[%s3139_s11 + $0x18] sm:$0xf]  ;;  %v601_v33 = vld [vmem:[#allocation4 + $0x88] sm:$0xff]  ;;  %v603_v34 = vld [vmem:[#allocation4 + $0x98] sm:$0xff]  ;;  %v2394_v36 = vpack.c.bf16 %v384_v31, %v382_v30  ;;  %v609_v52 = vrot.slane %v3142_v13, 2  ;;  %v610_v53 = vrot.slane %v3145_v14, 2 }
  0x6f   : > { %2386 = vmatpush1.bf16.msk.msra.mxu0 %vm3132_vm2, %v2384_v17  ;;  %v402_v26 = vsel %vm399_vm3, %v400_v18, %v401_v19  ;;  %v404_v35 = vsel %vm399_vm3, %v401_v19, %v403_v28  ;;  %v405_v37 = vrot.slane %v3159_v32, 1  ;;  %v2397_v38 = vpack.c.bf16 %v603_v34, %v601_v33  ;;  %v600_v40 = vld [vmem:[#allocation4 + $0x80] sm:$0xff]  ;;  %v602_v41 = vld [vmem:[#allocation4 + $0x90] sm:$0xff]  ;;  %v605_v42 = vld [vmem:[#allocation4 + $0xa8] sm:$0xff]  ;;  %s367_s23 = sand.u32 1, %s2905_s10   ;;  %s2212_s26 = sshll.u32 %s3000_s13, 4 }
  0x70   : > { %2388 = vmatprep.subr.bf16.mxu0 %v2387_v20  ;;  %v607_v43 = vld [vmem:[#allocation4 + $0xb8] sm:$0xf]  ;;  %v2399_v44 = vpack.c.bf16 %v602_v41, %v600_v40  ;;  %v604_v46 = vld [vmem:[#allocation4 + $0xa0] sm:$0xff]  ;;  %v606_v47 = vld [vmem:[#allocation4 + $0xb0] sm:$0xf]  ;;  %v611_v58 = vsel %vm608_vm5, %v609_v52, %v610_v53  ;;  %v612_v60 = vrot.slane %v3152_v23, 2  ;;  %s3353_s21 = scalar_lea.hbm %s3405_s9, %s2212_s26 }
  0x71   : > { %v406_v39 = vsel %vm399_vm3, %v403_v28, %v405_v37  ;;  %v2401_v45 = vpack.c.bf16 %v607_v43, %v605_v42  ;;  %v719_v48 = vld [vmem:[#allocation4 + $0xc8] sm:$0xff]  ;;  %v721_v49 = vld [vmem:[#allocation4 + $0xd8] sm:$0xff]  ;;  %v2404_v50 = vpack.c.bf16 %v606_v47, %v604_v46  ;;  %v718_v54 = vld [vmem:[#allocation4 + $0xc0] sm:$0xff]  ;;  %v614_v6 = vrot.slane %v3159_v32, 2  ;;  %s368_s14 = scalar_lea.vmem [#allocation10], %s367_s23  ;;  %s2066_s24 = scalar_lea.sflag [#allocation6], %s367_s23 }
  0x72   : > { %2178 = vmatmul.mubr.msk.f32.vlgmr.msra.gmra.mrb[0].mxu0 %vm407_vm4, %v402_v26  ;;  %v2407_v51 = vpack.c.bf16 %v721_v49, %v719_v48  ;;  %v720_v55 = vld [vmem:[#allocation4 + $0xd0] sm:$0xff]  ;;  %v723_v56 = vld [vmem:[#allocation4 + $0xe8] sm:$0xff]  ;;  %v725_v57 = vld [vmem:[#allocation4 + $0xf8] sm:$0xf]  ;;  %v613_v4 = vsel %vm608_vm5, %v610_v53, %v612_v60  ;;  %v727_v9 = vrot.slane %v3142_v13, 3  ;;  %v728_v10 = vrot.slane %v3145_v14, 3 }
  0x73   : > { %2390 = vmatpush1.bf16.msra.mxu0 %v2389_v27  ;;  %491 = vmatprep.mubr.f32.mxu0 %v2922_v0  ;;  %v2409_v59 = vpack.c.bf16 %v720_v55, %v718_v54  ;;  %v2411_v61 = vpack.c.bf16 %v725_v57, %v723_v56  ;;  %v722_v62 = vld [vmem:[#allocation4 + $0xe0] sm:$0xff]  ;;  %v724_v63 = vld [vmem:[#allocation4 + $0xf0] sm:$0xf]  ;;  %v837_v2 = vld [vmem:[#allocation4 + $0x108] sm:$0xff]  ;;  %v615_v8 = vsel %vm608_vm5, %v612_v60, %v614_v6  ;;  %v730_v19 = vrot.slane %v3152_v23, 3  ;;  %s2078_s16 = sshll.u32 %s368_s14, 4  ;;  %s3355_s16 = int_to_ptr.vmem [resolvable:$true] %s2078_s16 }
  0x74   : > { %2393 = vmatprep.subr.msk.bf16.mxu0 %vm3132_vm2, %v2391_v29  ;;  %v839_v3 = vld [vmem:[#allocation4 + $0x118] sm:$0xff]  ;;  %v2414_v5 = vpack.c.bf16 %v724_v63, %v722_v62  ;;  %v836_v11 = vld [vmem:[#allocation4 + $0x100] sm:$0xff]  ;;  %v838_v12 = vld [vmem:[#allocation4 + $0x110] sm:$0xff]  ;;  %v729_v17 = vsel %vm726_vm6, %v727_v9, %v728_v10  ;;  %v732_v26 = vrot.slane %v3159_v32, 3  ;;  %v844_v28 = vrot.slane %v3142_v13, 4  ;;  %s2843_s28 = scalar_lea.vmem %s3355_s16, 16 }
  0x75   : > { %v2417_v7 = vpack.c.bf16 %v839_v3, %v837_v2  ;;  %v841_v15 = vld [vmem:[#allocation4 + $0x128] sm:$0xff]  ;;  %v843_v16 = vld [vmem:[#allocation4 + $0x138] sm:$0xf]  ;;  %v2419_v18 = vpack.c.bf16 %v838_v12, %v836_v11  ;;  %v840_v21 = vld [vmem:[#allocation4 + $0x120] sm:$0xff]  ;;  %v731_v24 = vsel %vm726_vm6, %v728_v10, %v730_v19  ;;  %v845_v29 = vrot.slane %v3145_v14, 4  ;;  %p2844_p12 = scmp.ne.s32.totalorder %s3355_s16, %s2843_s28  ;;  %p3431_p7 = scmp.ne.s32.totalorder %s3418_s19, 0 }
  0x76   : > { %2179 = vmatmul.mubr.msk.f32.gmra.mrb[2].mxu0 %vm407_vm4, %v404_v35  ;;  %v2421_v20 = vpack.c.bf16 %v843_v16, %v841_v15  ;;  %v842_v22 = vld [vmem:[#allocation4 + $0x130] sm:$0xf]  ;;  %v733_v27 = vsel %vm726_vm6, %v730_v19, %v732_v26  ;;  %v847_v31 = vrot.slane %v3152_v23, 4  ;;  %v849_v33 = vrot.slane %v3159_v32, 4  ;;  %v1077_v34 = vld [vmem:[#allocation7 + $0x108] sm:$0xff]  ;;  %v1079_v37 = vld [vmem:[#allocation7 + $0x118] sm:$0xff] }
  0x77   : > { %497 = vmatprep.mubr.f32.mxu0 %v2922_v0  ;;  %2396 = vmatpush1.bf16.msk.msra.mxu0 %vm3132_vm2, %v2394_v36  ;;  %v2424_v25 = vpack.c.bf16 %v842_v22, %v840_v21  ;;  %v846_v30 = vsel %vm414_vm0, %v844_v28, %v845_v29  ;;  %v1074_v35 = vld [vmem:[#allocation7 + $0xf0] sm:$0xff]  ;;  %v1076_v36 = vld [vmem:[#allocation7 + $0x100] sm:$0xff]  ;;  %v954_v43 = vlaneseq  ;;  %v1083_v46 = vld [vmem:[#allocation7 + $0x138] sm:$0xff]  ;;  %vm1610_vm15 = vcmask 647168   ;;  %p2845_p8 = pnand %p2844_p12, %p3431_p7  ;;  %s2928_s13 = smov [#allocation10]  }
  0x78   : > { %2398 = vmatprep.subr.bf16.mxu0 %v2397_v38  ;;  %v848_v1 = vsel %vm414_vm0, %v845_v29, %v847_v31  ;;  %v1081_v38 = vld [vmem:[#allocation7 + $0x128] sm:$0xff]  ;;  %v1078_v41 = vld [vmem:[#allocation7 + $0x110] sm:$0xff]  ;;  %v1080_v42 = vld [vmem:[#allocation7 + $0x120] sm:$0xff]  ;;  %vm1614_vm1 = vcmask 651268   ;;  %vm1630_vm3 = vcmask 654336   ;;  %vm1972_vm5 = vcmask 408576  }
  0x79   : > { %v2431_v40 = vpack.c.bf16 %v1081_v38, %v1079_v37  ;;  %v2433_v32 = vpack.c.bf16 %v1080_v42, %v1078_v41  ;;  %v1085_v47 = vld [vmem:[#allocation7 + $0x148] sm:$0xff]  ;;  %v1082_v48 = vld [vmem:[#allocation7 + $0x130] sm:$0xff]  ;;  %v1084_v52 = vld [vmem:[#allocation7 + $0x140] sm:$0xff]  ;;  %vm2050_vm6 = vcmask 73728   ;;  %p2846_p11 = pneg %p2845_p8  ;;  %s2847_s11 = sshll.u32 %s2928_s13, 4  ;;  %s2848_s11 = int_to_ptr.vmem [resolvable:$false] %s2847_s11 }
  0x7a   : > { %2180 = vmatmul.mubr.msk.f32.gmra.mrb[4].mxu0 %vm407_vm4, %v406_v39  ;;  %v2429_v39 = vpack.c.bf16 %v1076_v36, %v1074_v35  ;;  %v952_v49 = vld [vmem:[%s3398_s2] sm:$0x3]  ;;  %v2437_v53 = vpack.c.bf16 %v1084_v52, %v1082_v48  ;;  %v1087_v55 = vld [vmem:[#allocation7 + $0x158] sm:$0xff]  ;;  %v1088_v60 = vld [vmem:[#allocation7 + $0x160] sm:$0xff]  ;;  %s2849_s15 = scalar_lea.vmem %s2848_s11, 32  ;;  %p2850_p13 = scmp.lt.s32.totalorder %s3355_s16, %s2848_s11 }
  0x7b   : > { %580 = vmatprep.mubr.f32.mxu0 %v2922_v0  ;;  %v1089_v56 = vld [vmem:[#allocation7 + $0x168] sm:$0xff]  ;;  %v1091_v3 = vld [vmem:[#allocation7 + $0x178] sm:$0xff]  ;;  %v1094_v22 = vld [vmem:[#allocation7 + $0x190] sm:$0xff]  ;;  %p2851_p1 = scmp.lt.s32.totalorder %s2849_s15, %s2843_s28 }
  0x7c   : > { %v1097_v19 = vld [vmem:[#allocation7 + $0x1a8] sm:$0xff]  ;;  %v1098_v35 = vld [vmem:[#allocation7 + $0x1b0] sm:$0xff]  ;;  %v1103_v38 = vld [vmem:[#allocation7 + $0x1d8] sm:$0xff] }
  0x7d   : > { %p2852_p6 = por %p2851_p1, %p2850_p13 }
  0x7e   : > { %2183 = vmatmul.mubr.msk.f32.vlgmr.msra.gmra.mrb[0].mxu0 %vm407_vm4, %v3142_v13  ;;  %v850_v13 = vsel %vm414_vm0, %v847_v31, %v849_v33  ;;  %v1099_v33 = vld [vmem:[#allocation7 + $0x1b8] sm:$0xff]  ;;  %vm1612_vm0 = vcmask 649218  }
  0x7f   : > { %2400 = vmatpush1.bf16.msra.mxu0 %v2399_v44  ;;  %586 = vmatprep.mubr.f32.mxu0 %v2922_v0  ;;  %v3233_v44 = vshrl.u32 %v954_v43, 7  ;;  %v1102_v43 = vld [vmem:[#allocation7 + $0x1d0] sm:$0xff]  ;;  %p2853_p9 = pnand %p2852_p6, %p2846_p11 }
  0x80   : > { %2403 = vmatprep.subr.msk.bf16.mxu0 %vm3132_vm2, %v2401_v45 }
  0x81   : > { %v956_v45 = vsub.s32 0, %v3233_v44 }
  0x82   : > { %2184 = vmatmul.mubr.msk.f32.gmra.mrb[2].mxu0 %vm407_vm4, %v3145_v14  ;;  %v1075_v14 = vld [vmem:[#allocation7 + $0xf8] sm:$0xff] }
  0x83   : > { %592 = vmatprep.mubr.f32.mxu0 %v2922_v0  ;;  %2406 = vmatpush1.bf16.msk.msra.mxu0 %vm3132_vm2, %v2404_v50  ;;  %v960_v50 = vsub.s32 1, %v3233_v44  ;;  %v957_v54 = vrot.slane %v952_v49, %v956_v45 }
  0x84   : > { %2408 = vmatprep.subr.bf16.mxu0 %v2407_v51  ;;  %v2435_v51 = vpack.c.bf16 %v1085_v47, %v1083_v46 }
  0x85   : > { %v961_v57 = vrot.slane %v952_v49, %v960_v50 }
  0x86   : > { %2185 = vmatmul.mubr.msk.f32.gmra.mrb[4].mxu0 %vm407_vm4, %v3152_v23  ;;  %v2427_v23 = vpack.c.bf16 %v1077_v34, %v1075_v14 }
  0x87   : > { %692 = vmatprep.mubr.f32.mxu0 %v2922_v0 }
  0x88   : > { %2428 = vmatprep.subr.bf16.mxu1 %v2427_v23  ;;  %v1100_v23 = vld [vmem:[#allocation7 + $0x1c0] sm:$0xff] }
  0x89   : > { %2430 = vmatpush1.bf16.msra.mxu1 %v2429_v39  ;;  %v2453_v37 = vpack.c.bf16 %v1100_v23, %v1098_v35  ;;  %v1043_v39 = vld [vmem:[#allocation7 + $0x8] sm:$0xff]  ;;  %v1064_v35 = vld [vmem:[#allocation7 + $0xb0] sm:$0xff] }
  0x8a   : > { %2188 = vmatmul.mubr.msk.f32.vlgmr.msra.gmra.mrb[0].mxu0 %vm407_vm4, %v611_v58  ;;  %2432 = vmatprep.subr.bf16.mxu1 %v2431_v40  ;;  %v2439_v58 = vpack.c.bf16 %v1089_v56, %v1087_v55  ;;  %v1045_v40 = vld [vmem:[#allocation7 + $0x18] sm:$0xff]  ;;  %v1067_v23 = vld [vmem:[#allocation7 + $0xc8] sm:$0xff] }
  0x8b   : > { %2410 = vmatpush1.bf16.msra.mxu0 %v2409_v59  ;;  %698 = vmatprep.mubr.f32.mxu0 %v2922_v0  ;;  %v1086_v59 = vld [vmem:[#allocation7 + $0x150] sm:$0xff]  ;;  %v2455_v46 = vpack.c.bf16 %v1045_v40, %v1043_v39  ;;  %v1066_v39 = vld [vmem:[#allocation7 + $0xc0] sm:$0xff] }
  0x8c   : > { %2413 = vmatprep.subr.msk.bf16.mxu0 %vm3132_vm2, %v2411_v61  ;;  %v2441_v61 = vpack.c.bf16 %v1088_v60, %v1086_v59  ;;  %v1068_v40 = vld [vmem:[#allocation7 + $0xd0] sm:$0xff] }
  0x8d   : > { %2434 = vmatpush1.bf16.msra.mxu1 %v2433_v32 }
  0x8e   : > { %2189 = vmatmul.mubr.msk.f32.gmra.mrb[2].mxu0 %vm407_vm4, %v613_v4  ;;  %2436 = vmatprep.subr.bf16.mxu1 %v2435_v51  ;;  %v1093_v4 = vld [vmem:[#allocation7 + $0x188] sm:$0xff] }
  0x8f   : > { %704 = vmatprep.mubr.f32.mxu0 %v2922_v0  ;;  %2416 = vmatpush1.bf16.msk.msra.mxu0 %vm3132_vm2, %v2414_v5  ;;  %v2443_v6 = vpack.c.bf16 %v1093_v4, %v1091_v3  ;;  %v1044_v3 = vld [vmem:[#allocation7 + $0x10] sm:$0xff]  ;;  %v1047_v4 = vld [vmem:[#allocation7 + $0x28] sm:$0xff] }
  0x90   : > { %2418 = vmatprep.subr.bf16.mxu0 %v2417_v7  ;;  %v1090_v7 = vld [vmem:[#allocation7 + $0x170] sm:$0xff] }
  0x91   : > { %2438 = vmatpush1.bf16.msra.mxu1 %v2437_v53 }
  0x92   : > { %2190 = vmatmul.mubr.msk.f32.gmra.mrb[4].mxu0 %vm407_vm4, %v615_v8  ;;  %2440 = vmatprep.subr.bf16.mxu1 %v2439_v58  ;;  %v1092_v8 = vld [vmem:[#allocation7 + $0x180] sm:$0xff] }
  0x93   : > { %810 = vmatprep.mubr.f32.mxu0 %v2922_v0  ;;  %v2445_v10 = vpack.c.bf16 %v1092_v8, %v1090_v7  ;;  %v1046_v8 = vld [vmem:[#allocation7 + $0x20] sm:$0xff] }
  0x95   : > { %2442 = vmatpush1.bf16.msra.mxu1 %v2441_v61 }
  0x96   : > { %2193 = vmatmul.mubr.msk.f32.vlgmr.msra.gmra.mrb[0].mxu0 %vm407_vm4, %v729_v17  ;;  %2444 = vmatprep.subr.bf16.mxu1 %v2443_v6 }
  0x97   : > { %2420 = vmatpush1.bf16.msra.mxu0 %v2419_v18  ;;  %816 = vmatprep.mubr.f32.mxu0 %v2922_v0  ;;  %v1095_v18 = vld [vmem:[#allocation7 + $0x198] sm:$0xff] }
  0x98   : > { %2423 = vmatprep.subr.msk.bf16.mxu0 %vm3132_vm2, %v2421_v20  ;;  %v2447_v21 = vpack.c.bf16 %v1097_v19, %v1095_v18  ;;  %v1052_v18 = vld [vmem:[#allocation7 + $0x50] sm:$0xff]  ;;  %v1055_v19 = vld [vmem:[#allocation7 + $0x68] sm:$0xff] }
  0x99   : > { %2446 = vmatpush1.bf16.msra.mxu1 %v2445_v10 }
  0x9a   : > { %2194 = vmatmul.mubr.msk.f32.gmra.mrb[2].mxu0 %vm407_vm4, %v731_v24  ;;  %v1096_v24 = vld [vmem:[#allocation7 + $0x1a0] sm:$0xff]  ;;  %2448 = vmatprep.subr.bf16.mxu1 %v2447_v21 }
  0x9b   : > { %822 = vmatprep.mubr.f32.mxu0 %v2922_v0  ;;  %2426 = vmatpush1.bf16.msk.msra.mxu0 %vm3132_vm2, %v2424_v25  ;;  %v2449_v26 = vpack.c.bf16 %v1096_v24, %v1094_v22  ;;  %v1054_v24 = vld [vmem:[#allocation7 + $0x60] sm:$0xff]  ;;  %vm1616_vm2 = vcmask 653318  }
  0x9d   : > { %2450 = vmatpush1.bf16.msra.mxu1 %v2449_v26  ;;  %v1059_v26 = vld [vmem:[#allocation7 + $0x88] sm:$0xff] }
  0x9e   : > { %2195 = vmatmul.mubr.msk.f32.gmra.mrb[4].mxu0 %vm407_vm4, %v733_v27 }
  0x9f   : > { %927 = vmatprep.mubr.f32.mxu0 %v2922_v0 }
  0xa2   : > { %2198 = vmatmul.mubr.msk.f32.vlgmr.msra.gmra.mrb[0].mxu0 %vm407_vm4, %v846_v30 }
  0xa3   : > { %933 = vmatprep.mubr.f32.mxu0 %v2922_v0 }
  0xa6   : > { %2199 = vmatmul.mubr.msk.f32.gmra.mrb[2].mxu0 %vm407_vm4, %v848_v1 }
  0xa7   : > { %939 = vmatprep.mubr.f32.mxu0 %v2922_v0 }
  0xaa   : > { %2200 = vmatmul.mubr.msk.f32.gmra.mrb[4].mxu0 %vm407_vm4, %v850_v13  ;;  %v1101_v13 = vld [vmem:[#allocation7 + $0x1c8] sm:$0xff]  ;;  %vm1976_vm4 = vcmask 1041408  }
  0xab   : > { %v2451_v34 = vpack.c.bf16 %v1101_v13, %v1099_v33  ;;  %v1065_v33 = vld [vmem:[#allocation7 + $0xb8] sm:$0xff]  ;;  %2288 = vmatprep.mubr.msk.f32.mxu0 %vm2926_vm13, %v2922_v0 }
  0xad   : > { %2452 = vmatprep.subr.bf16.mxu1 %v2451_v34  ;;  %v1062_v34 = vld [vmem:[#allocation7 + $0xa0] sm:$0xff] }
  0xae   : > { %2454 = vmatpush1.bf16.msra.mxu1 %v2453_v37  ;;  %v2477_v37 = vpack.c.bf16 %v1064_v35, %v1062_v34  ;;  %v1370_v34 = vld [vmem:[#allocation7 + $0x308] sm:$0xff]  ;;  %v1283_v35 = vld [vmem:[#allocation7 + $0x2c0] sm:$0xff] }
  0xaf   : > { %1136 = vmatprep.subr.mxu1 %v1103_v38 }
  0xb2   : > { %1137 = vmatpush1.msra.mxu1 %v1102_v43  ;;  %v1258_v43 = vld [vmem:[#allocation7 + $0x1f8] sm:$0xff] }
  0xb3   : > { %2456 = vmatprep.subr.bf16.mxu1 %v2455_v46  ;;  %v1255_v46 = vld [vmem:[#allocation7 + $0x1e0] sm:$0xff] }
 0x175   : > { %v929_v62 = vpop.f32.mrb[0].mxu0 }
 0x176   : > { %v964_v63 = vadd.f32 %v957_v54, %v929_v62  ;;  %v931_v2 = vpop.f32.mrb[1].mxu0 }
 0x177   : > { %v965_v5 = vadd.f32 %v961_v57, %v931_v2  ;;  %v1042_v2 = vld [vmem:[#allocation7] sm:$0xff] }
 0x178   : > { %v972_v9 = vrot.slane %v964_v63, 1  ;;  %v2457_v6 = vpack.c.bf16 %v1044_v3, %v1042_v2  ;;  %v1268_v2 = vld [vmem:[#allocation7 + $0x248] sm:$0xff]  ;;  %v1270_v3 = vld [vmem:[#allocation7 + $0x258] sm:$0xff] }
 0x179   : > { %v935_v11 = vpop.f32.mrb[2].mxu0  ;;  %v973_v12 = vrot.slane %v965_v5, 1 }
 0x17a   : > { %v966_v15 = vadd.f32 %v957_v54, %v935_v11  ;;  %v937_v16 = vpop.f32.mrb[3].mxu0  ;;  %v976_v17 = vmax.f32 %v964_v63, %v972_v9  ;;  %v1048_v9 = vld [vmem:[#allocation7 + $0x30] sm:$0xff]  ;;  %v1051_v11 = vld [vmem:[#allocation7 + $0x48] sm:$0xff] }
 0x17b   : > { %v967_v20 = vadd.f32 %v961_v57, %v937_v16  ;;  %v977_v28 = vmax.f32 %v965_v5, %v973_v12  ;;  %v1049_v5 = vld [vmem:[#allocation7 + $0x38] sm:$0xff] }
 0x17c   : > { %v999_v25 = vrot.slane %v966_v15, 1  ;;  %980 = vrot.lane.b32.xlu0 %v976_v17, %s2924_s17  ;;  %v2459_v7 = vpack.c.bf16 %v1049_v5, %v1047_v4  ;;  %v1053_v12 = vld [vmem:[#allocation7 + $0x58] sm:$0xff]  ;;  %v2495_v5 = vpack.c.bf16 %v1270_v3, %v1268_v2  ;;  %v1383_v3 = vld [vmem:[#allocation7 + $0x370] sm:$0xff] }
 0x17d   : > { %v941_v27 = vpop.f32.mrb[4].mxu0  ;;  %v1000_v29 = vrot.slane %v967_v20, 1  ;;  %v2463_v16 = vpack.c.bf16 %v1053_v12, %v1051_v11  ;;  %v1271_v12 = vld [vmem:[#allocation7 + $0x260] sm:$0xff] }
 0x17e   : > { %v968_v30 = vadd.f32 %v957_v54, %v941_v27  ;;  %v943_v31 = vpop.f32.mrb[5].mxu0  ;;  %v1003_v1 = vmax.f32 %v966_v15, %v999_v25  ;;  %v2461_v15 = vpack.c.bf16 %v1048_v9, %v1046_v8  ;;  %v1056_v25 = vld [vmem:[#allocation7 + $0x70] sm:$0xff]  ;;  %v1061_v27 = vld [vmem:[#allocation7 + $0x98] sm:$0xff]  ;;  %v1272_v8 = vld [vmem:[#allocation7 + $0x268] sm:$0xff] }
 0x17f   : > { %v969_v14 = vadd.f32 %v961_v57, %v943_v31  ;;  %v1004_v41 = vmax.f32 %v967_v20, %v1000_v29  ;;  %v1057_v20 = vld [vmem:[#allocation7 + $0x78] sm:$0xff]  ;;  %v2471_v29 = vpack.c.bf16 %v1061_v27, %v1059_v26  ;;  %v1060_v31 = vld [vmem:[#allocation7 + $0x90] sm:$0xff]  ;;  %v1279_v27 = vld [vmem:[#allocation7 + $0x2a0] sm:$0xff] }
 0x180   : > { %v1021_v36 = vrot.slane %v968_v30, 1  ;;  %982 = vrot.lane.b32.xlu0 %v977_v28, %s2924_s17  ;;  %1007 = vrot.lane.b32.xlu1 %v1003_v1, %s2924_s17  ;;  %v2467_v22 = vpack.c.bf16 %v1057_v20, %v1055_v19  ;;  %v2469_v28 = vpack.c.bf16 %v1056_v25, %v1054_v24  ;;  %v1274_v9 = vld [vmem:[#allocation7 + $0x278] sm:$0xff]  ;;  %v1275_v20 = vld [vmem:[#allocation7 + $0x280] sm:$0xff] }
 0x181   : > { %v1022_v32 = vrot.slane %v969_v14, 1  ;;  %v2499_v11 = vpack.c.bf16 %v1274_v9, %v1272_v8  ;;  %v1282_v24 = vld [vmem:[#allocation7 + $0x2b8] sm:$0xff]  ;;  %v1387_v9 = vld [vmem:[#allocation7 + $0x390] sm:$0xff] }
 0x182   : > { %v1025_v42 = vmax.f32 %v968_v30, %v1021_v36  ;;  %v1058_v30 = vld [vmem:[#allocation7 + $0x80] sm:$0xff]  ;;  %v1069_v36 = vld [vmem:[#allocation7 + $0xd8] sm:$0xff] }
 0x183   : > { %v1026_v47 = vmax.f32 %v969_v14, %v1022_v32  ;;  %v2473_v13 = vpack.c.bf16 %v1060_v31, %v1058_v30  ;;  %v2479_v38 = vpack.c.bf16 %v1069_v36, %v1067_v23  ;;  %v1256_v32 = vld [vmem:[#allocation7 + $0x1e8] sm:$0xff]  ;;  %v1364_v31 = vld [vmem:[#allocation7 + $0x2d8] sm:$0xff] }
 0x184   : > { %1009 = vrot.lane.b32.xlu1 %v1004_v41, %s2924_s17  ;;  %1029 = vrot.lane.b32.xlu0 %v1025_v42, %s2924_s17  ;;  %v2481_v41 = vpack.c.bf16 %v1068_v40, %v1066_v39  ;;  %v1284_v30 = vld [vmem:[#allocation7 + $0x2c8] sm:$0xff]  ;;  %v1369_v39 = vld [vmem:[#allocation7 + $0x300] sm:$0xff] }
 0x188   : > { %1031 = vrot.lane.b32.xlu1 %v1026_v47, %s2924_s17  ;;  %v1257_v47 = vld [vmem:[#allocation7 + $0x1f0] sm:$0xff] }
 0x1ee   : > { %v981_v48 = vpop.permute.xlu0 %980 }
 0x1f2   : > { %v983_v49 = vpop.permute.xlu0 %982  ;;  %v1008_v51 = vpop.permute.xlu1 %1007 }
 0x1f3   : > { %v985_v52 = vsel %vm984_vm7, %v981_v48, %v983_v49  ;;  %v1260_v48 = vld [vmem:[#allocation7 + $0x208] sm:$0xff]  ;;  %v1262_v49 = vld [vmem:[#allocation7 + $0x218] sm:$0xff] }
 0x1f4   : > { %v987_v53 = vmax.f32 %v976_v17, %v985_v52  ;;  %v1050_v17 = vld [vmem:[#allocation7 + $0x40] sm:$0xff]  ;;  %v2483_v52 = vpack.c.bf16 %v1258_v43, %v1256_v32 }
 0x1f5   : > { %v2465_v21 = vpack.c.bf16 %v1052_v18, %v1050_v17  ;;  %v1278_v17 = vld [vmem:[#allocation7 + $0x298] sm:$0xff] }
 0x1f6   : > { %v988_v54 = vmax.f32 %v987_v53, 0.0  ;;  %v1010_v55 = vpop.permute.xlu1 %1009  ;;  %v1030_v59 = vpop.permute.xlu0 %1029  ;;  %v2485_v53 = vpack.c.bf16 %v1257_v47, %v1255_v46  ;;  %v1371_v46 = vld [vmem:[#allocation7 + $0x310] sm:$0xff]  ;;  %v1373_v47 = vld [vmem:[#allocation7 + $0x320] sm:$0xff] }
 0x1f7   : > { %v1011_v56 = vsel %vm984_vm7, %v1008_v51, %v1010_v55  ;;  %v1070_v51 = vld [vmem:[#allocation7 + $0xe0] sm:$0xff] }
 0x1f8   : > { %990 = vst.msk [vmem:[#allocation2] sm:$0x1] %vm989_vm8, %v988_v54  ;;  %v1013_v57 = vmax.f32 %v1003_v1, %v1011_v56  ;;  %v1063_v1 = vld [vmem:[#allocation7 + $0xa8] sm:$0xff]  ;;  %v1259_v55 = vld [vmem:[#allocation7 + $0x200] sm:$0xff]  ;;  %v1261_v56 = vld [vmem:[#allocation7 + $0x210] sm:$0xff] }
 0x1f9   : > { %992 = vst.msk [vmem:[#allocation2 - $0x1] sm:$0x4] %vm991_vm9, %v988_v54  ;;  %v2475_v14 = vpack.c.bf16 %v1065_v33, %v1063_v1  ;;  %v1366_v1 = vld [vmem:[#allocation7 + $0x2e8] sm:$0xff]  ;;  %v1363_v33 = vld [vmem:[#allocation7 + $0x2d0] sm:$0xff] }
 0x1fa   : > { %994 = vst.msk [vmem:[#allocation2 - $0x2] sm:$0x10] %vm993_vm10, %v988_v54  ;;  %v1014_v58 = vmax.f32 %v1013_v57, 0.0  ;;  %v1032_v60 = vpop.permute.xlu1 %1031  ;;  %v2511_v23 = vpack.c.bf16 %v1366_v1, %v1364_v31 }
 0x1fb   : > { %996 = vst.msk [vmem:[#allocation2 - $0x3] sm:$0x40] %vm995_vm11, %v988_v54  ;;  %v1033_v61 = vsel %vm984_vm7, %v1030_v59, %v1032_v60  ;;  %v2487_v54 = vpack.c.bf16 %v1262_v49, %v1260_v48  ;;  %v1266_v59 = vld [vmem:[#allocation7 + $0x238] sm:$0xff]  ;;  %v2489_v60 = vpack.c.bf16 %v1261_v56, %v1259_v55  ;;  %v1378_v49 = vld [vmem:[#allocation7 + $0x348] sm:$0xff] }
 0x1fc   : > { %1015 = vst.msk [vmem:[#allocation2 + $0x4] sm:$0x1] %vm989_vm8, %v1014_v58  ;;  %v1035_v62 = vmax.f32 %v1025_v42, %v1033_v61  ;;  %v1071_v42 = vld [vmem:[#allocation7 + $0xe8] sm:$0xff]  ;;  %v1376_v48 = vld [vmem:[#allocation7 + $0x338] sm:$0xff] }
 0x1fd   : > { %1016 = vst.msk [vmem:[#allocation2 + $0x3] sm:$0x4] %vm991_vm9, %v1014_v58  ;;  %v1380_v55 = vld [vmem:[#allocation7 + $0x358] sm:$0xff]  ;;  %v1382_v56 = vld [vmem:[#allocation7 + $0x368] sm:$0xff] }
 0x1fe   : > { %1017 = vst.msk [vmem:[#allocation2 + $0x2] sm:$0x10] %vm993_vm10, %v1014_v58  ;;  %v1036_v63 = vmax.f32 %v1035_v62, 0.0  ;;  %v1263_v62 = vld [vmem:[#allocation7 + $0x220] sm:$0xff] }
 0x1ff   : > { %1018 = vst.msk [vmem:[#allocation2 + $0x1] sm:$0x40] %vm995_vm11, %v1014_v58  ;;  %v1264_v58 = vld [vmem:[#allocation7 + $0x228] sm:$0xff] }
 0x200   : > { %1037 = vst.msk [vmem:[#allocation2 + $0x8] sm:$0x1] %vm989_vm8, %v1036_v63  ;;  %v2491_v61 = vpack.c.bf16 %v1266_v59, %v1264_v58  ;;  %v2527_v58 = vpack.c.bf16 %v1382_v56, %v1380_v55  ;;  %v1379_v59 = vld [vmem:[#allocation7 + $0x350] sm:$0xff]  ;;  %v1495_v56 = vld [vmem:[#allocation7 + $0x480] sm:$0xff] }
 0x201   : > { %1038 = vst.msk [vmem:[#allocation2 + $0x7] sm:$0x4] %vm991_vm9, %v1036_v63 }
 0x202   : > { %1039 = vst.msk [vmem:[#allocation2 + $0x6] sm:$0x10] %vm993_vm10, %v1036_v63 }
 0x203   : > { %1040 = vst.msk [vmem:[#allocation2 + $0x5] sm:$0x40] %vm995_vm11, %v1036_v63  ;;  %v1265_v63 = vld [vmem:[#allocation7 + $0x230] sm:$0xff] }
 0x204   : > { %v2493_v4 = vpack.c.bf16 %v1265_v63, %v1263_v62  ;;  %v1386_v62 = vld [vmem:[#allocation7 + $0x388] sm:$0xff] }
 0x206   : > { %v1041_v57 = vld [vmem:[#allocation2] sm:$0xff] }
 0x207   : > { %v1072_v10 = vld [vmem:[#allocation2 + $0x1] sm:$0xff] }
 0x208   : > { %2201 = vmatmul.mubr.msk.f32.vlgmr.msra.gmra.mrb[0].mxu1 %vm1104_vm12, %v1072_v10  ;;  %v1253_v40 = vld [vmem:[#allocation2 + $0x2] sm:$0xff] }
 0x209   : > { %2458 = vmatpush1.bf16.msra.mxu1 %v2457_v6  ;;  %1246 = vmatprep.mubr.f32.mxu1 %v2922_v0  ;;  %v1267_v6 = vld [vmem:[#allocation7 + $0x240] sm:$0xff] }
 0x20a   : > { %2460 = vmatprep.subr.bf16.mxu1 %v2459_v7  ;;  %v1269_v7 = vld [vmem:[#allocation7 + $0x250] sm:$0xff] }
 0x20b   : > { %v2497_v10 = vpack.c.bf16 %v1269_v7, %v1267_v6  ;;  %v1390_v6 = vld [vmem:[#allocation7 + $0x3a8] sm:$0xff] }
 0x20d   : > { %2462 = vmatpush1.bf16.msra.mxu1 %v2461_v15  ;;  %v1273_v15 = vld [vmem:[#allocation7 + $0x270] sm:$0xff] }
 0x20e   : > { %2464 = vmatprep.subr.bf16.mxu1 %v2463_v16  ;;  %v1276_v16 = vld [vmem:[#allocation7 + $0x288] sm:$0xff]  ;;  %v2501_v18 = vpack.c.bf16 %v1273_v15, %v1271_v12  ;;  %v1392_v12 = vld [vmem:[#allocation7 + $0x3b8] sm:$0xff] }
 0x20f   : > { %v2503_v19 = vpack.c.bf16 %v1278_v17, %v1276_v16  ;;  %v1472_v15 = vld [vmem:[#allocation7 + $0x3c8] sm:$0xff]  ;;  %v1474_v16 = vld [vmem:[#allocation7 + $0x3d8] sm:$0xff]  ;;  %v1471_v17 = vld [vmem:[#allocation7 + $0x3c0] sm:$0xff] }
 0x211   : > { %2466 = vmatpush1.bf16.msra.mxu1 %v2465_v21  ;;  %v1277_v21 = vld [vmem:[#allocation7 + $0x290] sm:$0xff] }
 0x212   : > { %2468 = vmatprep.subr.bf16.mxu1 %v2467_v22  ;;  %v1280_v22 = vld [vmem:[#allocation7 + $0x2a8] sm:$0xff]  ;;  %v2505_v25 = vpack.c.bf16 %v1277_v21, %v1275_v20  ;;  %v1478_v20 = vld [vmem:[#allocation7 + $0x3f8] sm:$0xff]  ;;  %v1391_v21 = vld [vmem:[#allocation7 + $0x3b0] sm:$0xff] }
 0x213   : > { %v2507_v26 = vpack.c.bf16 %v1282_v24, %v1280_v22  ;;  %v2539_v22 = vpack.c.bf16 %v1474_v16, %v1472_v15  ;;  %v1627_v15 = vld [vmem:[#allocation9 + $0x38] sm:$0xff] }
 0x215   : > { %2470 = vmatpush1.bf16.msra.mxu1 %v2469_v28  ;;  %v1281_v28 = vld [vmem:[#allocation7 + $0x2b0] sm:$0xff] }
 0x216   : > { %2472 = vmatprep.subr.bf16.mxu1 %v2471_v29  ;;  %v2509_v29 = vpack.c.bf16 %v1281_v28, %v1279_v27  ;;  %v1477_v27 = vld [vmem:[#allocation7 + $0x3f0] sm:$0xff] }
 0x217   : > { %v1361_v28 = vld [vmem:[#allocation2 + $0x3] sm:$0xff] }
 0x219   : > { %2474 = vmatpush1.bf16.msra.mxu1 %v2473_v13  ;;  %v1365_v13 = vld [vmem:[#allocation7 + $0x2e0] sm:$0xff] }
 0x21a   : > { %2476 = vmatprep.subr.bf16.mxu1 %v2475_v14  ;;  %v1368_v14 = vld [vmem:[#allocation7 + $0x2f8] sm:$0xff]  ;;  %v2513_v36 = vpack.c.bf16 %v1365_v13, %v1363_v33  ;;  %v1479_v33 = vld [vmem:[#allocation7 + $0x400] sm:$0xff]  ;;  %v1481_v13 = vld [vmem:[#allocation7 + $0x410] sm:$0xff] }
 0x21d   : > { %2478 = vmatpush1.bf16.msra.mxu1 %v2477_v37  ;;  %v2515_v37 = vpack.c.bf16 %v1370_v34, %v1368_v14  ;;  %v1484_v14 = vld [vmem:[#allocation7 + $0x428] sm:$0xff]  ;;  %v1486_v34 = vld [vmem:[#allocation7 + $0x438] sm:$0xff] }
 0x21e   : > { %2480 = vmatprep.subr.bf16.mxu1 %v2479_v38  ;;  %v1367_v38 = vld [vmem:[#allocation7 + $0x2f0] sm:$0xff] }
 0x21f   : > { %v2517_v32 = vpack.c.bf16 %v1369_v39, %v1367_v38  ;;  %v1488_v38 = vld [vmem:[#allocation7 + $0x448] sm:$0xff]  ;;  %v1490_v39 = vld [vmem:[#allocation7 + $0x458] sm:$0xff] }
 0x221   : > { %2482 = vmatpush1.bf16.msra.mxu1 %v2481_v41  ;;  %v1372_v41 = vld [vmem:[#allocation7 + $0x318] sm:$0xff] }
 0x222   : > { %1210 = vmatprep.subr.mxu1 %v1071_v42  ;;  %v1374_v42 = vld [vmem:[#allocation7 + $0x328] sm:$0xff] }
 0x223   : > { %v2519_v43 = vpack.c.bf16 %v1374_v42, %v1372_v41  ;;  %v2555_v41 = vpack.c.bf16 %v1490_v39, %v1488_v38  ;;  %v1487_v42 = vld [vmem:[#allocation7 + $0x440] sm:$0xff]  ;;  %v1713_v39 = vld [vmem:[#allocation9 + $0x80] sm:$0xff] }
 0x225   : > { %1211 = vmatpush1.msra.mxu1 %v1070_v51  ;;  %v2521_v51 = vpack.c.bf16 %v1373_v47, %v1371_v46  ;;  %v1494_v46 = vld [vmem:[#allocation7 + $0x478] sm:$0xff] }
 0x226   : > { %2202 = vmatmul.mubr.msk.f32.vlgmr.msra.gmra.mrb[0].mxu1 %vm1104_vm12, %v1041_v57  ;;  %2484 = vmatprep.subr.bf16.mxu1 %v2483_v52  ;;  %v2523_v52 = vpack.c.bf16 %v1378_v49, %v1376_v48  ;;  %v1491_v49 = vld [vmem:[#allocation7 + $0x460] sm:$0xff] }
 0x227   : > { %2486 = vmatpush1.bf16.msra.mxu1 %v2485_v53  ;;  %1352 = vmatprep.mubr.f32.mxu1 %v2922_v0  ;;  %v1375_v53 = vld [vmem:[#allocation7 + $0x330] sm:$0xff] }
 0x228   : > { %2488 = vmatprep.subr.bf16.mxu1 %v2487_v54  ;;  %v1377_v54 = vld [vmem:[#allocation7 + $0x340] sm:$0xff] }
 0x229   : > { %v2525_v57 = vpack.c.bf16 %v1377_v54, %v1375_v53  ;;  %v1498_v53 = vld [vmem:[#allocation7 + $0x498] sm:$0xff] }
 0x22b   : > { %2490 = vmatpush1.bf16.msra.mxu1 %v2489_v60  ;;  %v1381_v60 = vld [vmem:[#allocation7 + $0x360] sm:$0xff] }
 0x22c   : > { %2492 = vmatprep.subr.bf16.mxu1 %v2491_v61  ;;  %v1384_v61 = vld [vmem:[#allocation7 + $0x378] sm:$0xff]  ;;  %v2529_v63 = vpack.c.bf16 %v1381_v60, %v1379_v59  ;;  %v1500_v59 = vld [vmem:[#allocation7 + $0x4a8] sm:$0xff]  ;;  %v1499_v60 = vld [vmem:[#allocation7 + $0x4a0] sm:$0xff] }
 0x22d   : > { %v2531_v2 = vpack.c.bf16 %v1386_v62, %v1384_v61  ;;  %v1469_v61 = vld [vmem:[#allocation2 + $0x4] sm:$0xff] }
 0x22e   : > { %v1620_v62 = vld [vmem:[#allocation9] sm:$0xff] }
 0x22f   : > { %2494 = vmatpush1.bf16.msra.mxu1 %v2493_v4  ;;  %v1385_v4 = vld [vmem:[#allocation7 + $0x380] sm:$0xff] }
 0x230   : > { %2496 = vmatprep.subr.bf16.mxu1 %v2495_v5  ;;  %v1388_v5 = vld [vmem:[#allocation7 + $0x398] sm:$0xff]  ;;  %v2533_v7 = vpack.c.bf16 %v1385_v4, %v1383_v3  ;;  %v2925_v3 = vmov 0.0|0.0  }
 0x231   : > { %v2535_v8 = vpack.c.bf16 %v1390_v6, %v1388_v5  ;;  %2567 = vmatprep.subr.bf16.mxu0 %v2925_v3  ;;  %v1623_v5 = vld [vmem:[#allocation9 + $0x18] sm:$0xff] }
 0x233   : > { %2498 = vmatpush1.bf16.msra.mxu1 %v2497_v10  ;;  %v1389_v10 = vld [vmem:[#allocation7 + $0x3a0] sm:$0xff] }
 0x234   : > { %2500 = vmatprep.subr.bf16.mxu1 %v2499_v11  ;;  %v2537_v11 = vpack.c.bf16 %v1389_v10, %v1387_v9  ;;  %v1577_v9 = vld [vmem:[%s3400_s4] sm:$0x3] }
 0x235   : > { %v1586_v16 = vrot.slane %v1577_v9, %v960_v50 }
 0x237   : > { %2502 = vmatpush1.bf16.msra.mxu1 %v2501_v18  ;;  %v1473_v18 = vld [vmem:[#allocation7 + $0x3d0] sm:$0xff] }
 0x238   : > { %2504 = vmatprep.subr.bf16.mxu1 %v2503_v19  ;;  %v1476_v19 = vld [vmem:[#allocation7 + $0x3e8] sm:$0xff]  ;;  %v2541_v24 = vpack.c.bf16 %v1473_v18, %v1471_v17 }
 0x23b   : > { %2506 = vmatpush1.bf16.msra.mxu1 %v2505_v25  ;;  %v2543_v25 = vpack.c.bf16 %v1478_v20, %v1476_v19  ;;  %v1628_v19 = vld [vmem:[#allocation9 + $0x40] sm:$0xff]  ;;  %v1629_v20 = vld [vmem:[#allocation9 + $0x48] sm:$0xff] }
 0x23c   : > { %2508 = vmatprep.subr.bf16.mxu1 %v2507_v26  ;;  %v1475_v26 = vld [vmem:[#allocation7 + $0x3e0] sm:$0xff] }
 0x23d   : > { %v2545_v31 = vpack.c.bf16 %v1477_v27, %v1475_v26 }
 0x23f   : > { %2510 = vmatpush1.bf16.msra.mxu1 %v2509_v29  ;;  %v1480_v29 = vld [vmem:[#allocation7 + $0x408] sm:$0xff] }
 0x240   : > { %1316 = vmatprep.subr.mxu1 %v1284_v30  ;;  %v1482_v30 = vld [vmem:[#allocation7 + $0x418] sm:$0xff] }
 0x241   : > { %v2547_v1 = vpack.c.bf16 %v1482_v30, %v1480_v29 }
 0x243   : > { %1317 = vmatpush1.msra.mxu1 %v1283_v35  ;;  %v2549_v35 = vpack.c.bf16 %v1481_v13, %v1479_v33  ;;  %v1708_v33 = vld [vmem:[#allocation9 + $0x58] sm:$0xff] }
 0x244   : > { %2203 = vmatmul.mubr.msk.f32.vlgmr.msra.gmra.mrb[0].mxu1 %vm1104_vm12, %v1253_v40  ;;  %2512 = vmatprep.subr.bf16.mxu1 %v2511_v23  ;;  %v2551_v23 = vpack.c.bf16 %v1486_v34, %v1484_v14  ;;  %v1709_v14 = vld [vmem:[#allocation9 + $0x60] sm:$0xff]  ;;  %v1710_v34 = vld [vmem:[#allocation9 + $0x68] sm:$0xff] }
 0x245   : > { %2514 = vmatpush1.bf16.msra.mxu1 %v2513_v36  ;;  %1460 = vmatprep.mubr.f32.mxu1 %v2922_v0  ;;  %v1483_v36 = vld [vmem:[#allocation7 + $0x420] sm:$0xff] }
 0x246   : > { %2516 = vmatprep.subr.bf16.mxu1 %v2515_v37  ;;  %v1485_v37 = vld [vmem:[#allocation7 + $0x430] sm:$0xff] }
 0x247   : > { %v2553_v40 = vpack.c.bf16 %v1485_v37, %v1483_v36  ;;  %v1711_v36 = vld [vmem:[#allocation9 + $0x70] sm:$0xff]  ;;  %v1712_v37 = vld [vmem:[#allocation9 + $0x78] sm:$0xff] }
 0x248   : > { %v2589_v38 = vpack.c.bf16 %v1712_v37, %v1711_v36 }
 0x249   : > { %2518 = vmatpush1.bf16.msra.mxu1 %v2517_v32  ;;  %v1489_v32 = vld [vmem:[#allocation7 + $0x450] sm:$0xff] }
 0x24a   : > { %2520 = vmatprep.subr.bf16.mxu1 %v2519_v43  ;;  %v1492_v43 = vld [vmem:[#allocation7 + $0x468] sm:$0xff]  ;;  %v2557_v47 = vpack.c.bf16 %v1489_v32, %v1487_v42  ;;  %v1715_v42 = vld [vmem:[#allocation9 + $0x90] sm:$0xff] }
 0x24b   : > { %v2559_v48 = vpack.c.bf16 %v1494_v46, %v1492_v43  ;;  %v1716_v32 = vld [vmem:[#allocation9 + $0x98] sm:$0xff]  ;;  %v1793_v46 = vld [vmem:[#allocation9 + $0xa0] sm:$0xff] }
 0x24c   : > { %v2595_v43 = vpack.c.bf16 %v1716_v32, %v1715_v42 }
 0x24d   : > { %2522 = vmatpush1.bf16.msra.mxu1 %v2521_v51  ;;  %v1493_v51 = vld [vmem:[#allocation7 + $0x470] sm:$0xff] }
 0x24e   : > { %2524 = vmatprep.subr.bf16.mxu1 %v2523_v52  ;;  %v1496_v52 = vld [vmem:[#allocation7 + $0x488] sm:$0xff]  ;;  %v2561_v54 = vpack.c.bf16 %v1493_v51, %v1491_v49  ;;  %v1795_v49 = vld [vmem:[#allocation9 + $0xb0] sm:$0xff] }
 0x24f   : > { %v2563_v55 = vpack.c.bf16 %v1498_v53, %v1496_v52  ;;  %v1796_v51 = vld [vmem:[#allocation9 + $0xb8] sm:$0xff] }
 0x250   : > { %v2601_v53 = vpack.c.bf16 %v1796_v51, %v1795_v49 }
 0x251   : > { %2526 = vmatpush1.bf16.msra.mxu1 %v2525_v57  ;;  %v1497_v57 = vld [vmem:[#allocation7 + $0x490] sm:$0xff] }
 0x252   : > { %2528 = vmatprep.subr.bf16.mxu1 %v2527_v58  ;;  %v2565_v58 = vpack.c.bf16 %v1497_v57, %v1495_v56  ;;  %v1799_v57 = vld [vmem:[#allocation9 + $0xd0] sm:$0xff] }
 0x255   : > { %2530 = vmatpush1.bf16.msra.mxu1 %v2529_v63  ;;  %v1621_v63 = vld [vmem:[#allocation9 + $0x8] sm:$0xff] }
 0x256   : > { %2532 = vmatprep.subr.bf16.mxu1 %v2531_v2  ;;  %v1622_v2 = vld [vmem:[#allocation9 + $0x10] sm:$0xff]  ;;  %v2568_v4 = vpack.c.bf16 %v1621_v63, %v1620_v62 }
 0x257   : > { %v2571_v6 = vpack.c.bf16 %v1623_v5, %v1622_v2  ;;  %v1879_v63 = vld [vmem:[#allocation9 + $0xf0] sm:$0xff]  ;;  %v1880_v2 = vld [vmem:[#allocation9 + $0xf8] sm:$0xff]  ;;  %v1881_v5 = vld [vmem:[#allocation9 + $0x100] sm:$0xff] }
 0x258   : > { %2569 = vmatpush3.bf16.msra.mxu0 %v2568_v4  ;;  %v2613_v4 = vpack.c.bf16 %v1880_v2, %v1879_v63 }
 0x259   : > { %2534 = vmatpush1.bf16.msra.mxu1 %v2533_v7  ;;  %2570 = vmatprep.subr.bf16.mxu0 %v2925_v3  ;;  %v1624_v7 = vld [vmem:[#allocation9 + $0x20] sm:$0xff] }
 0x25a   : > { %2536 = vmatprep.subr.bf16.mxu1 %v2535_v8  ;;  %v1625_v8 = vld [vmem:[#allocation9 + $0x28] sm:$0xff] }
 0x25b   : > { %v2574_v10 = vpack.c.bf16 %v1625_v8, %v1624_v7 }
 0x25c   : > { %2572 = vmatpush3.bf16.msra.mxu0 %v2571_v6  ;;  %v1882_v6 = vld [vmem:[#allocation9 + $0x108] sm:$0xff] }
 0x25d   : > { %2538 = vmatpush1.bf16.msra.mxu1 %v2537_v11  ;;  %2573 = vmatprep.subr.bf16.mxu0 %v2925_v3  ;;  %v1582_v11 = vrot.slane %v1577_v9, %v956_v45  ;;  %v2616_v8 = vpack.c.bf16 %v1882_v6, %v1881_v5  ;;  %v1883_v9 = vld [vmem:[#allocation9 + $0x110] sm:$0xff] }
 0x25e   : > { %1424 = vmatprep.subr.mxu1 %v1392_v12  ;;  %v1626_v12 = vld [vmem:[#allocation9 + $0x30] sm:$0xff] }
 0x25f   : > { %v2577_v17 = vpack.c.bf16 %v1627_v15, %v1626_v12  ;;  %v1885_v12 = vld [vmem:[#allocation9 + $0x120] sm:$0xff]  ;;  %v1886_v15 = vld [vmem:[#allocation9 + $0x128] sm:$0xff] }
 0x260   : > { %2575 = vmatpush3.bf16.msra.mxu0 %v2574_v10  ;;  %v1884_v10 = vld [vmem:[#allocation9 + $0x118] sm:$0xff] }
 0x261   : > { %1425 = vmatpush1.msra.mxu1 %v1391_v21  ;;  %2576 = vmatprep.subr.bf16.mxu0 %v2925_v3 }
 0x262   : > { %2204 = vmatmul.mubr.msk.f32.vlgmr.msra.gmra.mrb[0].mxu1 %vm1104_vm12, %v1361_v28  ;;  %2540 = vmatprep.subr.bf16.mxu1 %v2539_v22 }
 0x263   : > { %2542 = vmatpush1.bf16.msra.mxu1 %v2541_v24  ;;  %1568 = vmatprep.mubr.f32.mxu1 %v2922_v0  ;;  %v2580_v24 = vpack.c.bf16 %v1629_v20, %v1628_v19  ;;  %v1964_v20 = vld [vmem:[%s3403_s7] sm:$0xff] }
 0x264   : > { %2544 = vmatprep.subr.bf16.mxu1 %v2543_v25  ;;  %2578 = vmatpush3.bf16.msra.mxu0 %v2577_v17  ;;  %v1887_v17 = vld [vmem:[#allocation9 + $0x130] sm:$0xff] }
 0x265   : > { %2579 = vmatprep.subr.bf16.mxu0 %v2925_v3 }
 0x267   : > { %2546 = vmatpush1.bf16.msra.mxu1 %v2545_v31 }
 0x268   : > { %2548 = vmatprep.subr.bf16.mxu1 %v2547_v1  ;;  %2581 = vmatpush3.bf16.msra.mxu0 %v2580_v24  ;;  %v1707_v1 = vld [vmem:[#allocation9 + $0x50] sm:$0xff] }
 0x269   : > { %2582 = vmatprep.subr.bf16.mxu0 %v2925_v3  ;;  %v2583_v13 = vpack.c.bf16 %v1708_v33, %v1707_v1  ;;  %v1966_v24 = vld [vmem:[%s3403_s7 + $0x10] sm:$0xff] }
 0x26b   : > { %2550 = vmatpush1.bf16.msra.mxu1 %v2549_v35 }
 0x26c   : > { %2552 = vmatprep.subr.bf16.mxu1 %v2551_v23  ;;  %v2586_v23 = vpack.c.bf16 %v1710_v34, %v1709_v14 }
 0x26f   : > { %2554 = vmatpush1.bf16.msra.mxu1 %v2553_v40  ;;  %v1714_v40 = vld [vmem:[#allocation9 + $0x88] sm:$0xff] }
 0x270   : > { %2556 = vmatprep.subr.bf16.mxu1 %v2555_v41  ;;  %v2592_v41 = vpack.c.bf16 %v1714_v40, %v1713_v39 }
 0x273   : > { %2558 = vmatpush1.bf16.msra.mxu1 %v2557_v47  ;;  %v1794_v47 = vld [vmem:[#allocation9 + $0xa8] sm:$0xff] }
 0x274   : > { %2560 = vmatprep.subr.bf16.mxu1 %v2559_v48  ;;  %v2598_v48 = vpack.c.bf16 %v1794_v47, %v1793_v46 }
 0x277   : > { %2562 = vmatpush1.bf16.msra.mxu1 %v2561_v54  ;;  %v1797_v54 = vld [vmem:[#allocation9 + $0xc0] sm:$0xff] }
 0x278   : > { %2564 = vmatprep.subr.bf16.mxu1 %v2563_v55  ;;  %v1798_v55 = vld [vmem:[#allocation9 + $0xc8] sm:$0xff] }
 0x279   : > { %v2604_v56 = vpack.c.bf16 %v1798_v55, %v1797_v54 }
 0x27b   : > { %2566 = vmatpush1.bf16.msra.mxu1 %v2565_v58  ;;  %v1800_v58 = vld [vmem:[#allocation9 + $0xd8] sm:$0xff] }
 0x27c   : > { %1532 = vmatprep.subr.mxu1 %v1500_v59  ;;  %v2607_v59 = vpack.c.bf16 %v1800_v58, %v1799_v57 }
 0x27f   : > { %1533 = vmatpush1.msra.mxu1 %v1499_v60  ;;  %v1801_v60 = vld [vmem:[#allocation9 + $0xe0] sm:$0xff] }
 0x280   : > { %2205 = vmatmul.mubr.msk.f32.vlgmr.msra.gmra.mrb[0].mxu1 %vm1104_vm12, %v1469_v61  ;;  %v1802_v61 = vld [vmem:[#allocation9 + $0xe8] sm:$0xff] }
 0x281   : > { %v2610_v62 = vpack.c.bf16 %v1802_v61, %v1801_v60 }
 0x353   : > { %v1570_v18 = vpop.f32.mrb[0].mxu1 }
 0x354   : > { %v1589_v21 = vadd.f32 %v1582_v11, %v1570_v18  ;;  %v1572_v22 = vpop.f32.mrb[1].mxu1  ;;  %v2619_v11 = vpack.c.bf16 %v1884_v10, %v1883_v9  ;;  %v1888_v18 = vld [vmem:[#allocation9 + $0x138] sm:$0xff] }
 0x355   : > { %v1590_v45 = vadd.f32 %v1586_v16, %v1572_v22  ;;  %v2622_v16 = vpack.c.bf16 %v1886_v15, %v1885_v12  ;;  %v2625_v19 = vpack.c.bf16 %v1888_v18, %v1887_v17 }
 0x356   : > { %v1593_v25 = vrot.slane %v1589_v21, 1 }
 0x357   : > { %v1594_v26 = vrot.slane %v1590_v45, 1 }
 0x358   : > { %v1597_v44 = vmax.f32 %v1589_v21, %v1593_v25  ;;  %v1965_v21 = vld [vmem:[%s3403_s7 + $0x8] sm:$0xff] }
 0x359   : > { %v1598_v50 = vmax.f32 %v1590_v45, %v1594_v26  ;;  %v2628_v22 = vpack.c.bf16 %v1965_v21, %v1964_v20  ;;  %v1967_v45 = vld [vmem:[%s3403_s7 + $0x18] sm:$0xff] }
 0x35a   : > { %1601 = vrot.lane.b32.xlu0 %v1597_v44, %s2927_s27  ;;  %v2631_v26 = vpack.c.bf16 %v1967_v45, %v1966_v24 }
 0x35b   : > { %1603 = vrot.lane.b32.xlu1 %v1598_v50, %s2927_s27  ;;  %v1969_v50 = vld [vmem:[%s3403_s7 + $0x28] sm:$0xff] }
 0x3cc   : > { %v1602_v27 = vpop.permute.xlu0 %1601 }
 0x3cd   : > { %v1604_v28 = vpop.permute.xlu1 %1603 }
 0x3ce   : > { %v1606_v29 = vsel %vm1605_vm14, %v1602_v27, %v1604_v28  ;;  %v1970_v28 = vld [vmem:[%s3403_s7 + $0x30] sm:$0x3] }
 0x3cf   : > { %v1608_v30 = vmax.f32 %v1597_v44, %v1606_v29  ;;  %v1968_v44 = vld [vmem:[%s3403_s7 + $0x20] sm:$0xff] }
 0x3d0   : > { %v2634_v27 = vpack.c.bf16 %v1969_v50, %v1968_v44 }
 0x3d1   : > { %v1609_v31 = vmax.f32 %v1608_v30, 0.0 }
 0x3d3   : > { %1611 = vst.msk [vmem:[#allocation3] sm:$0x1] %vm1610_vm15, %v1609_v31 }
 0x3d4   : > { %1613 = vst.msk [vmem:[#allocation3 - $0x1] sm:$0x4] %vm1612_vm0, %v1609_v31 }
 0x3d5   : > { %1615 = vst.msk [vmem:[#allocation3 - $0x2] sm:$0x10] %vm1614_vm1, %v1609_v31 }
 0x3d6   : > { %1617 = vst.msk [vmem:[#allocation3 - $0x3] sm:$0x40] %vm1616_vm2, %v1609_v31 }
 0x3da   : > { %v1619_v35 = vld [vmem:[#allocation3] sm:$0x1] }
 0x3db   : > { %2289 = vmatmul.mubr.msk.f32.vlgmr.msra.gmra.mrb[6].mxu0 %vm1630_vm3, %v1619_v35  ;;  %v1705_v52 = vld [vmem:[#allocation3 + $0x1] sm:$0x1] }
 0x3dc   : > { %2584 = vmatpush3.bf16.msra.mxu0 %v2583_v13  ;;  %2311 = vmatprep.mubr.msk.f32.mxu0 %vm2926_vm13, %v2922_v0  ;;  %v1791_v7 = vld [vmem:[#allocation3 + $0x2] sm:$0x1] }
 0x3dd   : > { %2585 = vmatprep.subr.bf16.mxu0 %v2925_v3  ;;  %v1877_v25 = vld [vmem:[#allocation3 + $0x3] sm:$0x1] }
 0x3e0   : > { %2587 = vmatpush3.bf16.msra.mxu0 %v2586_v23 }
 0x3e1   : > { %2588 = vmatprep.subr.bf16.mxu0 %v2925_v3 }
 0x3e4   : > { %2590 = vmatpush3.bf16.msra.mxu0 %v2589_v38 }
 0x3e5   : > { %2591 = vmatprep.subr.bf16.mxu0 %v2925_v3 }
 0x3e8   : > { %2593 = vmatpush3.bf16.msra.mxu0 %v2592_v41 }
 0x3e9   : > { %2594 = vmatprep.subr.bf16.mxu0 %v2925_v3 }
 0x3ec   : > { %2596 = vmatpush3.bf16.msra.mxu0 %v2595_v43 }
 0x3ed   : > { %2597 = vmatprep.subr.bf16.mxu0 %v2925_v3 }
 0x3ef   : > { %2312 = vmatmul.mubr.msk.f32.vlgmr.msra.gmra.mrb[6].mxu0 %vm1630_vm3, %v1705_v52 }
 0x3f0   : > { %2599 = vmatpush3.bf16.msra.mxu0 %v2598_v48  ;;  %2334 = vmatprep.mubr.msk.f32.mxu0 %vm2926_vm13, %v2922_v0 }
 0x3f1   : > { %2600 = vmatprep.subr.bf16.mxu0 %v2925_v3 }
 0x3f4   : > { %2602 = vmatpush3.bf16.msra.mxu0 %v2601_v53 }
 0x3f5   : > { %2603 = vmatprep.subr.bf16.mxu0 %v2925_v3 }
 0x3f8   : > { %2605 = vmatpush3.bf16.msra.mxu0 %v2604_v56 }
 0x3f9   : > { %2606 = vmatprep.subr.bf16.mxu0 %v2925_v3 }
 0x3fc   : > { %2608 = vmatpush3.bf16.msra.mxu0 %v2607_v59 }
 0x3fd   : > { %2609 = vmatprep.subr.bf16.mxu0 %v2925_v3 }
 0x400   : > { %2611 = vmatpush3.bf16.msra.mxu0 %v2610_v62 }
 0x401   : > { %2612 = vmatprep.subr.bf16.mxu0 %v2925_v3 }
 0x403   : > { %2335 = vmatmul.mubr.msk.f32.vlgmr.msra.gmra.mrb[6].mxu0 %vm1630_vm3, %v1791_v7 }
 0x404   : > { %2614 = vmatpush3.bf16.msra.mxu0 %v2613_v4  ;;  %2357 = vmatprep.mubr.msk.f32.mxu0 %vm2926_vm13, %v2922_v0 }
 0x405   : > { %2615 = vmatprep.subr.bf16.mxu0 %v2925_v3 }
 0x408   : > { %2617 = vmatpush3.bf16.msra.mxu0 %v2616_v8 }
 0x409   : > { %2618 = vmatprep.subr.bf16.mxu0 %v2925_v3 }
 0x40c   : > { %2620 = vmatpush3.bf16.msra.mxu0 %v2619_v11 }
 0x40d   : > { %2621 = vmatprep.subr.bf16.mxu0 %v2925_v3 }
 0x410   : > { %2623 = vmatpush3.bf16.msra.mxu0 %v2622_v16 }
 0x411   : > { %2624 = vmatprep.subr.bf16.mxu0 %v2925_v3 }
 0x414   : > { %2626 = vmatpush3.bf16.msra.mxu0 %v2625_v19 }
 0x415   : > { %2627 = vmatprep.subr.bf16.mxu0 %v2925_v3 }
 0x417   : > { %2358 = vmatmul.mubr.msk.f32.vlgmr.msra.gmra.mrb[6].mxu0 %vm1630_vm3, %v1877_v25 }
 0x418   : > { %2629 = vmatpush3.bf16.msra.mxu0 %v2628_v22  ;;  %2374 = vmatprep.mubr.msk.f32.mxu0 %vm2926_vm13, %v2922_v0 }
 0x419   : > { %2630 = vmatprep.subr.bf16.mxu0 %v2925_v3 }
 0x41c   : > { %2632 = vmatpush3.bf16.msra.mxu0 %v2631_v26 }
 0x41d   : > { %2633 = vmatprep.subr.bf16.mxu0 %v2925_v3  ;;  %v1618_v3 = vld [vmem:[%s3402_s6] sm:$0x1] }
 0x420   : > { %2635 = vmatpush3.bf16.msra.mxu0 %v2634_v27 }
 0x421   : > { %2372 = vmatprep.subr.mxu0 %v2922_v0  ;;  %v1971_v0 = vld [vmem:[%s3404_s8] sm:$0x1] }
 0x424   : > { %2373 = vmatpush3.msk.msra.mxu0 %vm1976_vm4, %v1970_v28 }
 0x4ea   : > { %v1958_v29 = vpop.f32.mrb[6].mxu0 }
 0x4eb   : > { %v2636_v30 = vadd.f32 %v1958_v29, %v1618_v3  ;;  %v2359_v31 = vpop.f32.mrb[7].mxu0 }
 0x4ed   : > { %v1963_v1 = vmax.f32 %v2636_v30, 0.0 }
 0x4ef   : > { %2375 = vmatmul.mubr.msk.f32.vlgmr.msra.gmra.mrb[8].mxu0 %vm1972_vm5, %v1963_v1 }
 0x5c2   : > { %v2046_v33 = vpop.f32.mrb[8].mxu0 }
 0x5c3   : > { %v2047_v13 = vadd.f32 %v2046_v33, %v1971_v0  ;;  %v2376_v14 = vpop.f32.mrb[9].mxu0 }
 0x5c5   : > { %v2051_v34 = vsel %vm2050_vm6, %v2047_v13, -inf }
 0x5c6   : > { %2052 = vmax.xlane.f32.xlu0 %v2051_v34 }
 0x653   : > { %v2053_v35 = vpop.xlane.xlu0 %2052 }
 0x654   : > { %v2054_v23 = vsub.f32 %v2047_v13, %v2053_v35 }
 0x656   : > { %v2055_v36 = vmul.f32 1.442695, %v2054_v23 }
 0x658   : > { %2755 = vpow2.f32 %v2055_v36 }
 0x662   : > { %v2756_v37 = vpop.eup %2755 }
 0x663   : > { %v2057_v38 = vsel %vm2050_vm6, %v2756_v37, 0.0 }
 0x664   : > { %2058 = vadd.xlane.f32.xlu1 %v2057_v38 }
 0x6f1   : > { %v2059_v39 = vpop.xlane.xlu1 %2058 }
 0x6f2   : > { %2757 = vlog2.f32 %v2059_v39 }
 0x6fc   : > { %v2758_v40 = vpop.eup %2757 }
 0x6fd   : > { %v2061_v41 = vmul.f32 0.6931472, %v2758_v40 }
 0x6ff   : > { %v2062_v42 = vadd.f32 %v2061_v41, %v2053_v35 }
 0x701   : > { %v2063_v32 = vsub.f32 %v2047_v13, %v2062_v42 }
 0x703   : > { %2064 = vst.msk [vmem:[%s368_s14] sm:$0x1] %vm2050_vm6, %v2063_v32 }
 0x704   : > { %2856 = shalt.err (!%p2853_p9)
}
 0x705   : > { %s2857_s20 = scalar_lea.hbm %s3353_s21, 16  ;;  %s2861_s25 = scalar_lea.hbm %s3405_s9, 32 }
 0x706   : > { %p2858_p2 = scmp.ne.s32.totalorder %s3353_s21, %s2857_s20  ;;  %p2862_p5 = scmp.lt.u32.totalorder %s3353_s21, %s3405_s9 }
 0x707   : > { %p2863_p10 = scmp.lt.u32.totalorder %s2861_s25, %s2857_s20  ;;  %p2865_p12 = scmp.lt.u32.totalorder %s2857_s20, %s3353_s21 }
 0x708   : > { %p2859_p3 = pnand %p2858_p2, %p3431_p7 }
 0x709   : > { %p2864_p4 = por %p2863_p10, %p2862_p5 }
 0x70a   : > { %p2860_p0 = pneg %p2859_p3 }
 0x70b   : > { %p2866_p8 = por %p2865_p12, %p2864_p4 }
 0x70d   : > { %p2867_p11 = pnand %p2866_p8, %p2860_p0 }
 0x70f   : > { %2870 = shalt.err (!%p2867_p11)
}
 0x710   : > { %2687 = dma.vmem_to_hbm [thread:$0]  (%p3431_p7), %s3355_s16, 16, %s3353_s21, %s2066_s24  }
 0x711 PF: > { %s3432_s23 = sld [smem:[#allocation14_spill]]  ;;  %s3433_s26 = sld [smem:[#allocation18_spill]] }
 0x712   : > { %p2709_p13 = scmp.ge.s32.totalorder %s2913_s12, 2 }
 0x717   : > { %s2090_s14 = sand.u32 1, %s3432_s23   ;;  %p3434_p1 = scmp.ne.s32.totalorder %s3433_s26, 0 }
 0x718   : > { %s2091_s30 = scalar_lea.sflag [#allocation6], %s2090_s14 }
 0x719   : > { %p2700_p6 = pnand %p2709_p13, %p3434_p1 }
 0x71b   : > { %2896 = dma.done.wait (!%p2700_p6), %s2091_s30, 16  }
 0x71c   : > { %2898 = vsyncadd (!%p2700_p6), %s2091_s30, 4294967280  ;;  %s3435_s12 = sld [smem:[#allocation16_spill]]  ;;  %s3436_s18 = sld [smem:[#allocation15_spill]] }
 0x71d   : > { %s3437_s11 = sld [smem:[#allocation17_spill]]  ;;  %s3438_s30 = smov %s2905_s10 }
 0x722   : > { %p21_p9 = scmp.ge.s32.totalorder %s3435_s12, 4   ;;  %s3439_s10 = smov %s3436_s18 }
 0x724   :  { %23 = sbr.rel (!%p21_p9) target bundleno = 5 (0x5), region = 115 }
 0x72b   :  { %2095 = vsyncpa [#allocation5], 1 }
 0x72c   :  { %2097 = vsyncpa [#allocation5 + $0x1], 1 }
 0x72d   :  { %2098 = vsyncpa [#allocation8], 1 }
 0x72e   :  { %2099 = vsyncpa [#allocation6], 1 }
 0x72f   :  { %2101 = vsyncpa [#allocation6 + $0x1], 1 }

</bundles_post_ra>
